<compile_context>
chip_gen: v7x
topology: tpu7x:2x2x1
jax: 0.10.0
libtpu: 0.0.40
codegen_flags: <defaults>
</compile_context>

<pallas_src>
import numpy as np

import jax
import jax.numpy as jnp
from jax.experimental import pallas as pl
from jax.experimental.pallas import tpu as pltpu


# ----------------------------------------------------------------------------
# Demo-module dimensions
# ----------------------------------------------------------------------------
B = 2
CIN = 4
H = W = 8
L = H * W                 # 64 spatial positions (lanes)
C1 = 8                    # conv2d out channels
C2 = 8                    # conv1d out channels
K2D = 3
K1D = 3
IN_FEAT = C2 * L          # 512
OUT_FEAT = 32
CIN_PAD = 8               # pad Cin 4 -> 8 so every contraction dim is a multiple of 8


# ----------------------------------------------------------------------------
# Fused Pallas kernel: conv2d -> conv1d -> linear for one batch element
# ----------------------------------------------------------------------------
def _fused_quant_kernel(x_ref, w2_ref, s2_ref, b2_ref,
                        w1_ref, s1_ref, b1_ref,
                        wl_ref, bl_ref, o_ref):
    f32 = jnp.float32
    bf16 = jnp.bfloat16

    xb = x_ref[0]                                      # (CIN_PAD, L) bf16 (quantized input)

    # ---- QuantConv2d:  out = sum_t W2[t] @ (x @ S2[t]) + b2 -----------------
    # S2[t] is a 0/1 shift-and-mask matrix, so (x @ S2[t]) is an exact lane
    # permutation of the bf16 input (safe to re-cast to bf16).
    acc = None
    for t in range(K2D * K2D):
        tap = jnp.dot(xb, s2_ref[t],
                      preferred_element_type=f32).astype(bf16)       # (CIN_PAD, L)
        p = jnp.dot(w2_ref[t], tap, preferred_element_type=f32)      # (C1, L)
        acc = p if acc is None else acc + p
    h1 = acc + b2_ref[...]                                           # f32 (C1, L)

    # conv1d input_quant: FloatingPoint(8,7) 'nearest' == bf16 RNE
    q1 = h1.astype(bf16)

    # ---- QuantConv1d ---------------------------------------------------------
    acc = None
    for t in range(K1D):
        tap = jnp.dot(q1, s1_ref[t],
                      preferred_element_type=f32).astype(bf16)       # (C1, L)
        p = jnp.dot(w1_ref[t], tap, preferred_element_type=f32)      # (C2, L)
        acc = p if acc is None else acc + p
    h2 = acc + b1_ref[...]                                           # f32 (C2, L)

    # linear input_quant
    q2 = h2.astype(bf16)

    # ---- QuantLinear:  out[o] = sum_{c,l} q2[c,l] * Wlin[o, c*L + l] + b ----
    out = None
    for c in range(C2):
        p = jnp.dot(q2[c:c + 1, :], wl_ref[c],
                    preferred_element_type=f32)                      # (1, OUT_FEAT)
        out = p if out is None else out + p
    o_ref[0] = out + bl_ref[...]                                     # f32 (1, OUT_FEAT)


# ----------------------------------------------------------------------------
# Constant shift-and-mask matrices (built once on host, folded as weights)
# ----------------------------------------------------------------------------
def _conv2d_shift_matrices():
    s = np.zeros((K2D * K2D, L, L), np.float32)
    for kh in range(K2D):
        for kw in range(K2D):
            dh, dw = kh - 1, kw - 1                     # padding = 1
            t = kh * K2D + kw
            for h in range(H):
                for w in range(W):
                    hs, ws = h + dh, w + dw
                    if 0 <= hs < H and 0 <= ws < W:
                        s[t, hs * W + ws, h * W + w] = 1.0
    return jnp.asarray(s, jnp.bfloat16)


def _conv1d_shift_matrices():
    s = np.zeros((K1D, L, L), np.float32)
    for k in range(K1D):
        d = k - 1                                       # padding = 1
        for l in range(L):
            ls = l + d
            if 0 <= ls < L:
                s[k, ls, l] = 1.0
    return jnp.asarray(s, jnp.bfloat16)


# ----------------------------------------------------------------------------
# Wrapper: quantize (bf16 == FloatingPoint(8,7) nearest), reshape weights,
# single fused pallas_call with a parallel grid over batch.
# ----------------------------------------------------------------------------
def quantwrapper_forward(params, x):
    bf16 = jnp.bfloat16
    f32 = jnp.float32

    # Input / weight quantization (the bf16 cast IS the quantization).
    x_t = x.reshape(B, CIN, L).astype(bf16)
    x_t = jnp.pad(x_t, ((0, 0), (0, CIN_PAD - CIN), (0, 0)))

    w2 = jnp.transpose(params["conv2d_w"], (2, 3, 0, 1)).reshape(K2D * K2D, C1, CIN)
    w2 = jnp.pad(w2.astype(bf16), ((0, 0), (0, 0), (0, CIN_PAD - CIN)))
    b2 = params["conv2d_b"].reshape(C1, 1).astype(f32)

    w1 = jnp.transpose(params["conv1d_w"], (2, 0, 1)).astype(bf16)     # (K1D, C2, C1)
    b1 = params["conv1d_b"].reshape(C2, 1).astype(f32)

    wl = jnp.transpose(params["lin_w"].reshape(OUT_FEAT, C2, L),
                       (1, 2, 0)).astype(bf16)                         # (C2, L, OUT_FEAT)
    bl = params["lin_b"].reshape(1, OUT_FEAT).astype(f32)

    s2 = _conv2d_shift_matrices()
    s1 = _conv1d_shift_matrices()

    out = pl.pallas_call(
        _fused_quant_kernel,
        out_shape=jax.ShapeDtypeStruct((B, 1, OUT_FEAT), f32),
        grid=(B,),
        in_specs=[
            pl.BlockSpec((1, CIN_PAD, L), lambda b: (b, 0, 0)),        # x (per batch)
            pl.BlockSpec((K2D * K2D, C1, CIN_PAD), lambda b: (0, 0, 0)),
            pl.BlockSpec((K2D * K2D, L, L), lambda b: (0, 0, 0)),
            pl.BlockSpec((C1, 1), lambda b: (0, 0)),
            pl.BlockSpec((K1D, C2, C1), lambda b: (0, 0, 0)),
            pl.BlockSpec((K1D, L, L), lambda b: (0, 0, 0)),
            pl.BlockSpec((C2, 1), lambda b: (0, 0)),
            pl.BlockSpec((C2, L, OUT_FEAT), lambda b: (0, 0, 0)),
            pl.BlockSpec((1, OUT_FEAT), lambda b: (0, 0)),
        ],
        out_specs=pl.BlockSpec((1, 1, OUT_FEAT), lambda b: (b, 0, 0)),
        compiler_params=pltpu.CompilerParams(
            dimension_semantics=("parallel",)),   # v7x: one image per TensorCore
    )(x_t, w2, s2, b2, w1, s1, b1, wl, bl)

    return out.reshape(B, OUT_FEAT)


class QuantWrapper:
    """JAX analog of QuantWrapper(module, quant_scheme) for the demo module."""

    def __init__(self, params):
        self.params = params
        self._fwd = jax.jit(quantwrapper_forward)

    def __call__(self, x):
        return self._fwd(self.params, x)


# ----------------------------------------------------------------------------
# Pure-JAX reference (numerical sanity check)
# ----------------------------------------------------------------------------
def _q(a):
    return a.astype(jnp.bfloat16).astype(jnp.float32)


def ref_forward(params, x):
    h = jax.lax.conv_general_dilated(
        _q(x).astype(jnp.bfloat16), _q(params["conv2d_w"]).astype(jnp.bfloat16),
        window_strides=(1, 1), padding=((1, 1), (1, 1)),
        dimension_numbers=("NCHW", "OIHW", "NCHW"),
        preferred_element_type=jnp.float32)
    h = h + params["conv2d_b"][None, :, None, None]
    b, c, hh, ww = h.shape
    h = h.reshape(b, c, hh * ww)
    h = jax.lax.conv_general_dilated(
        _q(h), _q(params["conv1d_w"]),
        window_strides=(1,), padding=((1, 1),),
        dimension_numbers=("NCW", "OIW", "NCW"),
        preferred_element_type=jnp.float32)
    h = h + params["conv1d_b"][None, :, None]
    h = h.reshape(b, -1)
    return _q(h) @ _q(params["lin_w"]).T + params["lin_b"]


# ----------------------------------------------------------------------------
if __name__ == "__main__":
    key = jax.random.PRNGKey(0)
    ks = jax.random.split(key, 7)

    params = {
        "conv2d_w": jax.random.uniform(ks[0], (C1, CIN, K2D, K2D),
                                       jnp.float32, -0.3, 0.3),
        "conv2d_b": jax.random.uniform(ks[1], (C1,), jnp.float32, -0.1, 0.1),
        "conv1d_w": jax.random.uniform(ks[2], (C2, C1, K1D),
                                       jnp.float32, -0.2, 0.2),
        "conv1d_b": jax.random.uniform(ks[3], (C2,), jnp.float32, -0.1, 0.1),
        "lin_w": jax.random.uniform(ks[4], (OUT_FEAT, IN_FEAT),
                                    jnp.float32, -0.05, 0.05),
        "lin_b": jax.random.uniform(ks[5], (OUT_FEAT,), jnp.float32, -0.1, 0.1),
    }
    x = jax.random.normal(ks[6], (B, CIN, H, W), jnp.float32)

    model = QuantWrapper(params)
    y = jax.block_until_ready(model(x))
    y_ref = jax.block_until_ready(ref_forward(params, x))

    assert y.shape == (B, OUT_FEAT) and y.dtype == jnp.float32
    np.testing.assert_allclose(np.asarray(y), np.asarray(y_ref),
                               rtol=2e-2, atol=2e-2)

    print("KERNEL_OK")
</pallas_src>

<mosaic_0001>
module attributes {stable_mosaic.version = 11 : i64} {
  func.func @_fused_quant_kernel(%arg0: i32, %arg1: memref<1x8x64xbf16, #tpu.memory_space<vmem>>, %arg2: memref<9x8x8xbf16, #tpu.memory_space<vmem>>, %arg3: memref<9x64x64xbf16, #tpu.memory_space<vmem>>, %arg4: memref<8x1xf32, #tpu.memory_space<vmem>>, %arg5: memref<3x8x8xbf16, #tpu.memory_space<vmem>>, %arg6: memref<3x64x64xbf16, #tpu.memory_space<vmem>>, %arg7: memref<8x1xf32, #tpu.memory_space<vmem>>, %arg8: memref<8x64x32xbf16, #tpu.memory_space<vmem>>, %arg9: memref<1x32xf32, #tpu.memory_space<vmem>>, %arg10: memref<1x1x32xf32, #tpu.memory_space<vmem>>) attributes {dimension_semantics = [#tpu.dimension_semantics<parallel>], iteration_bounds = array<i64: 2>, scalar_prefetch = 0 : i64, scratch_operands = 0 : i64, tpu.core_type = #tpu.core_type<tc>, window_params = [{transform_indices = @transform_0, window_bounds = array<i64: 1, 8, 64>}, {pipeline_mode = #tpu.pipeline_mode<synchronous>, transform_indices = @transform_1, window_bounds = array<i64: 9, 8, 8>}, {pipeline_mode = #tpu.pipeline_mode<synchronous>, transform_indices = @transform_2, window_bounds = array<i64: 9, 64, 64>}, {pipeline_mode = #tpu.pipeline_mode<synchronous>, transform_indices = @transform_3, window_bounds = array<i64: 8, 1>}, {pipeline_mode = #tpu.pipeline_mode<synchronous>, transform_indices = @transform_4, window_bounds = array<i64: 3, 8, 8>}, {pipeline_mode = #tpu.pipeline_mode<synchronous>, transform_indices = @transform_5, window_bounds = array<i64: 3, 64, 64>}, {pipeline_mode = #tpu.pipeline_mode<synchronous>, transform_indices = @transform_6, window_bounds = array<i64: 8, 1>}, {pipeline_mode = #tpu.pipeline_mode<synchronous>, transform_indices = @transform_7, window_bounds = array<i64: 8, 64, 32>}, {pipeline_mode = #tpu.pipeline_mode<synchronous>, transform_indices = @transform_8, window_bounds = array<i64: 1, 32>}, {transform_indices = @transform_9, window_bounds = array<i64: 1, 1, 32>}]} {
    %c0 = arith.constant 0 : index
    %c0_0 = arith.constant 0 : index
    %c0_1 = arith.constant 0 : index
    %0 = vector.load %arg1[%c0, %c0_0, %c0_1] : memref<1x8x64xbf16, #tpu.memory_space<vmem>>, vector<1x8x64xbf16>
    %1 = vector.shape_cast %0 : vector<1x8x64xbf16> to vector<8x64xbf16>
    %c0_2 = arith.constant 0 : index
    %c0_3 = arith.constant 0 : index
    %c0_4 = arith.constant 0 : index
    %2 = vector.load %arg3[%c0_2, %c0_3, %c0_4] : memref<9x64x64xbf16, #tpu.memory_space<vmem>>, vector<1x64x64xbf16>
    %3 = vector.shape_cast %2 : vector<1x64x64xbf16> to vector<64x64xbf16>
    %cst = arith.constant dense<0.000000e+00> : vector<8x64xf32>
    %4 = tpu.matmul %1, %3, %cst {dimension_numbers = #tpu.dot_dimension_numbers<[1], [0], [0], [1], [0, 0, 1, 1], [], []>} : vector<8x64xbf16>, vector<64x64xbf16>, vector<8x64xf32> -> vector<8x64xf32>
    %5 = arith.truncf %4 : vector<8x64xf32> to vector<8x64xbf16>
    %c0_5 = arith.constant 0 : index
    %c0_6 = arith.constant 0 : index
    %c0_7 = arith.constant 0 : index
    %6 = vector.load %arg2[%c0_5, %c0_6, %c0_7] : memref<9x8x8xbf16, #tpu.memory_space<vmem>>, vector<1x8x8xbf16>
    %7 = vector.shape_cast %6 : vector<1x8x8xbf16> to vector<8x8xbf16>
    %cst_8 = arith.constant dense<0.000000e+00> : vector<8x64xf32>
    %8 = tpu.matmul %7, %5, %cst_8 {dimension_numbers = #tpu.dot_dimension_numbers<[1], [0], [0], [1], [0, 0, 1, 1], [], []>} : vector<8x8xbf16>, vector<8x64xbf16>, vector<8x64xf32> -> vector<8x64xf32>
    %c1 = arith.constant 1 : index
    %c0_9 = arith.constant 0 : index
    %c0_10 = arith.constant 0 : index
    %9 = vector.load %arg3[%c1, %c0_9, %c0_10] : memref<9x64x64xbf16, #tpu.memory_space<vmem>>, vector<1x64x64xbf16>
    %10 = vector.shape_cast %9 : vector<1x64x64xbf16> to vector<64x64xbf16>
    %cst_11 = arith.constant dense<0.000000e+00> : vector<8x64xf32>
    %11 = tpu.matmul %1, %10, %cst_11 {dimension_numbers = #tpu.dot_dimension_numbers<[1], [0], [0], [1], [0, 0, 1, 1], [], []>} : vector<8x64xbf16>, vector<64x64xbf16>, vector<8x64xf32> -> vector<8x64xf32>
    %12 = arith.truncf %11 : vector<8x64xf32> to vector<8x64xbf16>
    %c1_12 = arith.constant 1 : index
    %c0_13 = arith.constant 0 : index
    %c0_14 = arith.constant 0 : index
    %13 = vector.load %arg2[%c1_12, %c0_13, %c0_14] : memref<9x8x8xbf16, #tpu.memory_space<vmem>>, vector<1x8x8xbf16>
    %14 = vector.shape_cast %13 : vector<1x8x8xbf16> to vector<8x8xbf16>
    %cst_15 = arith.constant dense<0.000000e+00> : vector<8x64xf32>
    %15 = tpu.matmul %14, %12, %cst_15 {dimension_numbers = #tpu.dot_dimension_numbers<[1], [0], [0], [1], [0, 0, 1, 1], [], []>} : vector<8x8xbf16>, vector<8x64xbf16>, vector<8x64xf32> -> vector<8x64xf32>
    %16 = arith.addf %8, %15 : vector<8x64xf32>
    %c2 = arith.constant 2 : index
    %c0_16 = arith.constant 0 : index
    %c0_17 = arith.constant 0 : index
    %17 = vector.load %arg3[%c2, %c0_16, %c0_17] : memref<9x64x64xbf16, #tpu.memory_space<vmem>>, vector<1x64x64xbf16>
    %18 = vector.shape_cast %17 : vector<1x64x64xbf16> to vector<64x64xbf16>
    %cst_18 = arith.constant dense<0.000000e+00> : vector<8x64xf32>
    %19 = tpu.matmul %1, %18, %cst_18 {dimension_numbers = #tpu.dot_dimension_numbers<[1], [0], [0], [1], [0, 0, 1, 1], [], []>} : vector<8x64xbf16>, vector<64x64xbf16>, vector<8x64xf32> -> vector<8x64xf32>
    %20 = arith.truncf %19 : vector<8x64xf32> to vector<8x64xbf16>
    %c2_19 = arith.constant 2 : index
    %c0_20 = arith.constant 0 : index
    %c0_21 = arith.constant 0 : index
    %21 = vector.load %arg2[%c2_19, %c0_20, %c0_21] : memref<9x8x8xbf16, #tpu.memory_space<vmem>>, vector<1x8x8xbf16>
    %22 = vector.shape_cast %21 : vector<1x8x8xbf16> to vector<8x8xbf16>
    %cst_22 = arith.constant dense<0.000000e+00> : vector<8x64xf32>
    %23 = tpu.matmul %22, %20, %cst_22 {dimension_numbers = #tpu.dot_dimension_numbers<[1], [0], [0], [1], [0, 0, 1, 1], [], []>} : vector<8x8xbf16>, vector<8x64xbf16>, vector<8x64xf32> -> vector<8x64xf32>
    %24 = arith.addf %16, %23 : vector<8x64xf32>
    %c3 = arith.constant 3 : index
    %c0_23 = arith.constant 0 : index
    %c0_24 = arith.constant 0 : index
    %25 = vector.load %arg3[%c3, %c0_23, %c0_24] : memref<9x64x64xbf16, #tpu.memory_space<vmem>>, vector<1x64x64xbf16>
    %26 = vector.shape_cast %25 : vector<1x64x64xbf16> to vector<64x64xbf16>
    %cst_25 = arith.constant dense<0.000000e+00> : vector<8x64xf32>
    %27 = tpu.matmul %1, %26, %cst_25 {dimension_numbers = #tpu.dot_dimension_numbers<[1], [0], [0], [1], [0, 0, 1, 1], [], []>} : vector<8x64xbf16>, vector<64x64xbf16>, vector<8x64xf32> -> vector<8x64xf32>
    %28 = arith.truncf %27 : vector<8x64xf32> to vector<8x64xbf16>
    %c3_26 = arith.constant 3 : index
    %c0_27 = arith.constant 0 : index
    %c0_28 = arith.constant 0 : index
    %29 = vector.load %arg2[%c3_26, %c0_27, %c0_28] : memref<9x8x8xbf16, #tpu.memory_space<vmem>>, vector<1x8x8xbf16>
    %30 = vector.shape_cast %29 : vector<1x8x8xbf16> to vector<8x8xbf16>
    %cst_29 = arith.constant dense<0.000000e+00> : vector<8x64xf32>
    %31 = tpu.matmul %30, %28, %cst_29 {dimension_numbers = #tpu.dot_dimension_numbers<[1], [0], [0], [1], [0, 0, 1, 1], [], []>} : vector<8x8xbf16>, vector<8x64xbf16>, vector<8x64xf32> -> vector<8x64xf32>
    %32 = arith.addf %24, %31 : vector<8x64xf32>
    %c4 = arith.constant 4 : index
    %c0_30 = arith.constant 0 : index
    %c0_31 = arith.constant 0 : index
    %33 = vector.load %arg3[%c4, %c0_30, %c0_31] : memref<9x64x64xbf16, #tpu.memory_space<vmem>>, vector<1x64x64xbf16>
    %34 = vector.shape_cast %33 : vector<1x64x64xbf16> to vector<64x64xbf16>
    %cst_32 = arith.constant dense<0.000000e+00> : vector<8x64xf32>
    %35 = tpu.matmul %1, %34, %cst_32 {dimension_numbers = #tpu.dot_dimension_numbers<[1], [0], [0], [1], [0, 0, 1, 1], [], []>} : vector<8x64xbf16>, vector<64x64xbf16>, vector<8x64xf32> -> vector<8x64xf32>
    %36 = arith.truncf %35 : vector<8x64xf32> to vector<8x64xbf16>
    %c4_33 = arith.constant 4 : index
    %c0_34 = arith.constant 0 : index
    %c0_35 = arith.constant 0 : index
    %37 = vector.load %arg2[%c4_33, %c0_34, %c0_35] : memref<9x8x8xbf16, #tpu.memory_space<vmem>>, vector<1x8x8xbf16>
    %38 = vector.shape_cast %37 : vector<1x8x8xbf16> to vector<8x8xbf16>
    %cst_36 = arith.constant dense<0.000000e+00> : vector<8x64xf32>
    %39 = tpu.matmul %38, %36, %cst_36 {dimension_numbers = #tpu.dot_dimension_numbers<[1], [0], [0], [1], [0, 0, 1, 1], [], []>} : vector<8x8xbf16>, vector<8x64xbf16>, vector<8x64xf32> -> vector<8x64xf32>
    %40 = arith.addf %32, %39 : vector<8x64xf32>
    %c5 = arith.constant 5 : index
    %c0_37 = arith.constant 0 : index
    %c0_38 = arith.constant 0 : index
    %41 = vector.load %arg3[%c5, %c0_37, %c0_38] : memref<9x64x64xbf16, #tpu.memory_space<vmem>>, vector<1x64x64xbf16>
    %42 = vector.shape_cast %41 : vector<1x64x64xbf16> to vector<64x64xbf16>
    %cst_39 = arith.constant dense<0.000000e+00> : vector<8x64xf32>
    %43 = tpu.matmul %1, %42, %cst_39 {dimension_numbers = #tpu.dot_dimension_numbers<[1], [0], [0], [1], [0, 0, 1, 1], [], []>} : vector<8x64xbf16>, vector<64x64xbf16>, vector<8x64xf32> -> vector<8x64xf32>
    %44 = arith.truncf %43 : vector<8x64xf32> to vector<8x64xbf16>
    %c5_40 = arith.constant 5 : index
    %c0_41 = arith.constant 0 : index
    %c0_42 = arith.constant 0 : index
    %45 = vector.load %arg2[%c5_40, %c0_41, %c0_42] : memref<9x8x8xbf16, #tpu.memory_space<vmem>>, vector<1x8x8xbf16>
    %46 = vector.shape_cast %45 : vector<1x8x8xbf16> to vector<8x8xbf16>
    %cst_43 = arith.constant dense<0.000000e+00> : vector<8x64xf32>
    %47 = tpu.matmul %46, %44, %cst_43 {dimension_numbers = #tpu.dot_dimension_numbers<[1], [0], [0], [1], [0, 0, 1, 1], [], []>} : vector<8x8xbf16>, vector<8x64xbf16>, vector<8x64xf32> -> vector<8x64xf32>
    %48 = arith.addf %40, %47 : vector<8x64xf32>
    %c6 = arith.constant 6 : index
    %c0_44 = arith.constant 0 : index
    %c0_45 = arith.constant 0 : index
    %49 = vector.load %arg3[%c6, %c0_44, %c0_45] : memref<9x64x64xbf16, #tpu.memory_space<vmem>>, vector<1x64x64xbf16>
    %50 = vector.shape_cast %49 : vector<1x64x64xbf16> to vector<64x64xbf16>
    %cst_46 = arith.constant dense<0.000000e+00> : vector<8x64xf32>
    %51 = tpu.matmul %1, %50, %cst_46 {dimension_numbers = #tpu.dot_dimension_numbers<[1], [0], [0], [1], [0, 0, 1, 1], [], []>} : vector<8x64xbf16>, vector<64x64xbf16>, vector<8x64xf32> -> vector<8x64xf32>
    %52 = arith.truncf %51 : vector<8x64xf32> to vector<8x64xbf16>
    %c6_47 = arith.constant 6 : index
    %c0_48 = arith.constant 0 : index
    %c0_49 = arith.constant 0 : index
    %53 = vector.load %arg2[%c6_47, %c0_48, %c0_49] : memref<9x8x8xbf16, #tpu.memory_space<vmem>>, vector<1x8x8xbf16>
    %54 = vector.shape_cast %53 : vector<1x8x8xbf16> to vector<8x8xbf16>
    %cst_50 = arith.constant dense<0.000000e+00> : vector<8x64xf32>
    %55 = tpu.matmul %54, %52, %cst_50 {dimension_numbers = #tpu.dot_dimension_numbers<[1], [0], [0], [1], [0, 0, 1, 1], [], []>} : vector<8x8xbf16>, vector<8x64xbf16>, vector<8x64xf32> -> vector<8x64xf32>
    %56 = arith.addf %48, %55 : vector<8x64xf32>
    %c7 = arith.constant 7 : index
    %c0_51 = arith.constant 0 : index
    %c0_52 = arith.constant 0 : index
    %57 = vector.load %arg3[%c7, %c0_51, %c0_52] : memref<9x64x64xbf16, #tpu.memory_space<vmem>>, vector<1x64x64xbf16>
    %58 = vector.shape_cast %57 : vector<1x64x64xbf16> to vector<64x64xbf16>
    %cst_53 = arith.constant dense<0.000000e+00> : vector<8x64xf32>
    %59 = tpu.matmul %1, %58, %cst_53 {dimension_numbers = #tpu.dot_dimension_numbers<[1], [0], [0], [1], [0, 0, 1, 1], [], []>} : vector<8x64xbf16>, vector<64x64xbf16>, vector<8x64xf32> -> vector<8x64xf32>
    %60 = arith.truncf %59 : vector<8x64xf32> to vector<8x64xbf16>
    %c7_54 = arith.constant 7 : index
    %c0_55 = arith.constant 0 : index
    %c0_56 = arith.constant 0 : index
    %61 = vector.load %arg2[%c7_54, %c0_55, %c0_56] : memref<9x8x8xbf16, #tpu.memory_space<vmem>>, vector<1x8x8xbf16>
    %62 = vector.shape_cast %61 : vector<1x8x8xbf16> to vector<8x8xbf16>
    %cst_57 = arith.constant dense<0.000000e+00> : vector<8x64xf32>
    %63 = tpu.matmul %62, %60, %cst_57 {dimension_numbers = #tpu.dot_dimension_numbers<[1], [0], [0], [1], [0, 0, 1, 1], [], []>} : vector<8x8xbf16>, vector<8x64xbf16>, vector<8x64xf32> -> vector<8x64xf32>
    %64 = arith.addf %56, %63 : vector<8x64xf32>
    %c8 = arith.constant 8 : index
    %c0_58 = arith.constant 0 : index
    %c0_59 = arith.constant 0 : index
    %65 = vector.load %arg3[%c8, %c0_58, %c0_59] : memref<9x64x64xbf16, #tpu.memory_space<vmem>>, vector<1x64x64xbf16>
    %66 = vector.shape_cast %65 : vector<1x64x64xbf16> to vector<64x64xbf16>
    %cst_60 = arith.constant dense<0.000000e+00> : vector<8x64xf32>
    %67 = tpu.matmul %1, %66, %cst_60 {dimension_numbers = #tpu.dot_dimension_numbers<[1], [0], [0], [1], [0, 0, 1, 1], [], []>} : vector<8x64xbf16>, vector<64x64xbf16>, vector<8x64xf32> -> vector<8x64xf32>
    %68 = arith.truncf %67 : vector<8x64xf32> to vector<8x64xbf16>
    %c8_61 = arith.constant 8 : index
    %c0_62 = arith.constant 0 : index
    %c0_63 = arith.constant 0 : index
    %69 = vector.load %arg2[%c8_61, %c0_62, %c0_63] : memref<9x8x8xbf16, #tpu.memory_space<vmem>>, vector<1x8x8xbf16>
    %70 = vector.shape_cast %69 : vector<1x8x8xbf16> to vector<8x8xbf16>
    %cst_64 = arith.constant dense<0.000000e+00> : vector<8x64xf32>
    %71 = tpu.matmul %70, %68, %cst_64 {dimension_numbers = #tpu.dot_dimension_numbers<[1], [0], [0], [1], [0, 0, 1, 1], [], []>} : vector<8x8xbf16>, vector<8x64xbf16>, vector<8x64xf32> -> vector<8x64xf32>
    %72 = arith.addf %64, %71 : vector<8x64xf32>
    %c0_65 = arith.constant 0 : index
    %c0_66 = arith.constant 0 : index
    %73 = vector.load %arg4[%c0_65, %c0_66] : memref<8x1xf32, #tpu.memory_space<vmem>>, vector<8x1xf32>
    %74 = vector.broadcast %73 : vector<8x1xf32> to vector<8x64xf32>
    %75 = arith.addf %72, %74 : vector<8x64xf32>
    %76 = arith.truncf %75 : vector<8x64xf32> to vector<8x64xbf16>
    %c0_67 = arith.constant 0 : index
    %c0_68 = arith.constant 0 : index
    %c0_69 = arith.constant 0 : index
    %77 = vector.load %arg6[%c0_67, %c0_68, %c0_69] : memref<3x64x64xbf16, #tpu.memory_space<vmem>>, vector<1x64x64xbf16>
    %78 = vector.shape_cast %77 : vector<1x64x64xbf16> to vector<64x64xbf16>
    %cst_70 = arith.constant dense<0.000000e+00> : vector<8x64xf32>
    %79 = tpu.matmul %76, %78, %cst_70 {dimension_numbers = #tpu.dot_dimension_numbers<[1], [0], [0], [1], [0, 0, 1, 1], [], []>} : vector<8x64xbf16>, vector<64x64xbf16>, vector<8x64xf32> -> vector<8x64xf32>
    %80 = arith.truncf %79 : vector<8x64xf32> to vector<8x64xbf16>
    %c0_71 = arith.constant 0 : index
    %c0_72 = arith.constant 0 : index
    %c0_73 = arith.constant 0 : index
    %81 = vector.load %arg5[%c0_71, %c0_72, %c0_73] : memref<3x8x8xbf16, #tpu.memory_space<vmem>>, vector<1x8x8xbf16>
    %82 = vector.shape_cast %81 : vector<1x8x8xbf16> to vector<8x8xbf16>
    %cst_74 = arith.constant dense<0.000000e+00> : vector<8x64xf32>
    %83 = tpu.matmul %82, %80, %cst_74 {dimension_numbers = #tpu.dot_dimension_numbers<[1], [0], [0], [1], [0, 0, 1, 1], [], []>} : vector<8x8xbf16>, vector<8x64xbf16>, vector<8x64xf32> -> vector<8x64xf32>
    %c1_75 = arith.constant 1 : index
    %c0_76 = arith.constant 0 : index
    %c0_77 = arith.constant 0 : index
    %84 = vector.load %arg6[%c1_75, %c0_76, %c0_77] : memref<3x64x64xbf16, #tpu.memory_space<vmem>>, vector<1x64x64xbf16>
    %85 = vector.shape_cast %84 : vector<1x64x64xbf16> to vector<64x64xbf16>
    %cst_78 = arith.constant dense<0.000000e+00> : vector<8x64xf32>
    %86 = tpu.matmul %76, %85, %cst_78 {dimension_numbers = #tpu.dot_dimension_numbers<[1], [0], [0], [1], [0, 0, 1, 1], [], []>} : vector<8x64xbf16>, vector<64x64xbf16>, vector<8x64xf32> -> vector<8x64xf32>
    %87 = arith.truncf %86 : vector<8x64xf32> to vector<8x64xbf16>
    %c1_79 = arith.constant 1 : index
    %c0_80 = arith.constant 0 : index
    %c0_81 = arith.constant 0 : index
    %88 = vector.load %arg5[%c1_79, %c0_80, %c0_81] : memref<3x8x8xbf16, #tpu.memory_space<vmem>>, vector<1x8x8xbf16>
    %89 = vector.shape_cast %88 : vector<1x8x8xbf16> to vector<8x8xbf16>
    %cst_82 = arith.constant dense<0.000000e+00> : vector<8x64xf32>
    %90 = tpu.matmul %89, %87, %cst_82 {dimension_numbers = #tpu.dot_dimension_numbers<[1], [0], [0], [1], [0, 0, 1, 1], [], []>} : vector<8x8xbf16>, vector<8x64xbf16>, vector<8x64xf32> -> vector<8x64xf32>
    %91 = arith.addf %83, %90 : vector<8x64xf32>
    %c2_83 = arith.constant 2 : index
    %c0_84 = arith.constant 0 : index
    %c0_85 = arith.constant 0 : index
    %92 = vector.load %arg6[%c2_83, %c0_84, %c0_85] : memref<3x64x64xbf16, #tpu.memory_space<vmem>>, vector<1x64x64xbf16>
    %93 = vector.shape_cast %92 : vector<1x64x64xbf16> to vector<64x64xbf16>
    %cst_86 = arith.constant dense<0.000000e+00> : vector<8x64xf32>
    %94 = tpu.matmul %76, %93, %cst_86 {dimension_numbers = #tpu.dot_dimension_numbers<[1], [0], [0], [1], [0, 0, 1, 1], [], []>} : vector<8x64xbf16>, vector<64x64xbf16>, vector<8x64xf32> -> vector<8x64xf32>
    %95 = arith.truncf %94 : vector<8x64xf32> to vector<8x64xbf16>
    %c2_87 = arith.constant 2 : index
    %c0_88 = arith.constant 0 : index
    %c0_89 = arith.constant 0 : index
    %96 = vector.load %arg5[%c2_87, %c0_88, %c0_89] : memref<3x8x8xbf16, #tpu.memory_space<vmem>>, vector<1x8x8xbf16>
    %97 = vector.shape_cast %96 : vector<1x8x8xbf16> to vector<8x8xbf16>
    %cst_90 = arith.constant dense<0.000000e+00> : vector<8x64xf32>
    %98 = tpu.matmul %97, %95, %cst_90 {dimension_numbers = #tpu.dot_dimension_numbers<[1], [0], [0], [1], [0, 0, 1, 1], [], []>} : vector<8x8xbf16>, vector<8x64xbf16>, vector<8x64xf32> -> vector<8x64xf32>
    %99 = arith.addf %91, %98 : vector<8x64xf32>
    %c0_91 = arith.constant 0 : index
    %c0_92 = arith.constant 0 : index
    %100 = vector.load %arg7[%c0_91, %c0_92] : memref<8x1xf32, #tpu.memory_space<vmem>>, vector<8x1xf32>
    %101 = vector.broadcast %100 : vector<8x1xf32> to vector<8x64xf32>
    %102 = arith.addf %99, %101 : vector<8x64xf32>
    %103 = arith.truncf %102 : vector<8x64xf32> to vector<8x64xbf16>
    %104 = vector.extract_strided_slice %103 {offsets = [0, 0], sizes = [1, 64], strides = [1, 1]} : vector<8x64xbf16> to vector<1x64xbf16>
    %c0_93 = arith.constant 0 : index
    %c0_94 = arith.constant 0 : index
    %c0_95 = arith.constant 0 : index
    %105 = vector.load %arg8[%c0_93, %c0_94, %c0_95] : memref<8x64x32xbf16, #tpu.memory_space<vmem>>, vector<1x64x32xbf16>
    %106 = vector.shape_cast %105 : vector<1x64x32xbf16> to vector<64x32xbf16>
    %cst_96 = arith.constant dense<0.000000e+00> : vector<1x32xf32>
    %107 = tpu.matmul %104, %106, %cst_96 {dimension_numbers = #tpu.dot_dimension_numbers<[1], [0], [0], [1], [0, 0, 1, 1], [], []>} : vector<1x64xbf16>, vector<64x32xbf16>, vector<1x32xf32> -> vector<1x32xf32>
    %108 = vector.extract_strided_slice %103 {offsets = [1, 0], sizes = [1, 64], strides = [1, 1]} : vector<8x64xbf16> to vector<1x64xbf16>
    %c1_97 = arith.constant 1 : index
    %c0_98 = arith.constant 0 : index
    %c0_99 = arith.constant 0 : index
    %109 = vector.load %arg8[%c1_97, %c0_98, %c0_99] : memref<8x64x32xbf16, #tpu.memory_space<vmem>>, vector<1x64x32xbf16>
    %110 = vector.shape_cast %109 : vector<1x64x32xbf16> to vector<64x32xbf16>
    %cst_100 = arith.constant dense<0.000000e+00> : vector<1x32xf32>
    %111 = tpu.matmul %108, %110, %cst_100 {dimension_numbers = #tpu.dot_dimension_numbers<[1], [0], [0], [1], [0, 0, 1, 1], [], []>} : vector<1x64xbf16>, vector<64x32xbf16>, vector<1x32xf32> -> vector<1x32xf32>
    %112 = arith.addf %107, %111 : vector<1x32xf32>
    %113 = vector.extract_strided_slice %103 {offsets = [2, 0], sizes = [1, 64], strides = [1, 1]} : vector<8x64xbf16> to vector<1x64xbf16>
    %c2_101 = arith.constant 2 : index
    %c0_102 = arith.constant 0 : index
    %c0_103 = arith.constant 0 : index
    %114 = vector.load %arg8[%c2_101, %c0_102, %c0_103] : memref<8x64x32xbf16, #tpu.memory_space<vmem>>, vector<1x64x32xbf16>
    %115 = vector.shape_cast %114 : vector<1x64x32xbf16> to vector<64x32xbf16>
    %cst_104 = arith.constant dense<0.000000e+00> : vector<1x32xf32>
    %116 = tpu.matmul %113, %115, %cst_104 {dimension_numbers = #tpu.dot_dimension_numbers<[1], [0], [0], [1], [0, 0, 1, 1], [], []>} : vector<1x64xbf16>, vector<64x32xbf16>, vector<1x32xf32> -> vector<1x32xf32>
    %117 = arith.addf %112, %116 : vector<1x32xf32>
    %118 = vector.extract_strided_slice %103 {offsets = [3, 0], sizes = [1, 64], strides = [1, 1]} : vector<8x64xbf16> to vector<1x64xbf16>
    %c3_105 = arith.constant 3 : index
    %c0_106 = arith.constant 0 : index
    %c0_107 = arith.constant 0 : index
    %119 = vector.load %arg8[%c3_105, %c0_106, %c0_107] : memref<8x64x32xbf16, #tpu.memory_space<vmem>>, vector<1x64x32xbf16>
    %120 = vector.shape_cast %119 : vector<1x64x32xbf16> to vector<64x32xbf16>
    %cst_108 = arith.constant dense<0.000000e+00> : vector<1x32xf32>
    %121 = tpu.matmul %118, %120, %cst_108 {dimension_numbers = #tpu.dot_dimension_numbers<[1], [0], [0], [1], [0, 0, 1, 1], [], []>} : vector<1x64xbf16>, vector<64x32xbf16>, vector<1x32xf32> -> vector<1x32xf32>
    %122 = arith.addf %117, %121 : vector<1x32xf32>
    %123 = vector.extract_strided_slice %103 {offsets = [4, 0], sizes = [1, 64], strides = [1, 1]} : vector<8x64xbf16> to vector<1x64xbf16>
    %c4_109 = arith.constant 4 : index
    %c0_110 = arith.constant 0 : index
    %c0_111 = arith.constant 0 : index
    %124 = vector.load %arg8[%c4_109, %c0_110, %c0_111] : memref<8x64x32xbf16, #tpu.memory_space<vmem>>, vector<1x64x32xbf16>
    %125 = vector.shape_cast %124 : vector<1x64x32xbf16> to vector<64x32xbf16>
    %cst_112 = arith.constant dense<0.000000e+00> : vector<1x32xf32>
    %126 = tpu.matmul %123, %125, %cst_112 {dimension_numbers = #tpu.dot_dimension_numbers<[1], [0], [0], [1], [0, 0, 1, 1], [], []>} : vector<1x64xbf16>, vector<64x32xbf16>, vector<1x32xf32> -> vector<1x32xf32>
    %127 = arith.addf %122, %126 : vector<1x32xf32>
    %128 = vector.extract_strided_slice %103 {offsets = [5, 0], sizes = [1, 64], strides = [1, 1]} : vector<8x64xbf16> to vector<1x64xbf16>
    %c5_113 = arith.constant 5 : index
    %c0_114 = arith.constant 0 : index
    %c0_115 = arith.constant 0 : index
    %129 = vector.load %arg8[%c5_113, %c0_114, %c0_115] : memref<8x64x32xbf16, #tpu.memory_space<vmem>>, vector<1x64x32xbf16>
    %130 = vector.shape_cast %129 : vector<1x64x32xbf16> to vector<64x32xbf16>
    %cst_116 = arith.constant dense<0.000000e+00> : vector<1x32xf32>
    %131 = tpu.matmul %128, %130, %cst_116 {dimension_numbers = #tpu.dot_dimension_numbers<[1], [0], [0], [1], [0, 0, 1, 1], [], []>} : vector<1x64xbf16>, vector<64x32xbf16>, vector<1x32xf32> -> vector<1x32xf32>
    %132 = arith.addf %127, %131 : vector<1x32xf32>
    %133 = vector.extract_strided_slice %103 {offsets = [6, 0], sizes = [1, 64], strides = [1, 1]} : vector<8x64xbf16> to vector<1x64xbf16>
    %c6_117 = arith.constant 6 : index
    %c0_118 = arith.constant 0 : index
    %c0_119 = arith.constant 0 : index
    %134 = vector.load %arg8[%c6_117, %c0_118, %c0_119] : memref<8x64x32xbf16, #tpu.memory_space<vmem>>, vector<1x64x32xbf16>
    %135 = vector.shape_cast %134 : vector<1x64x32xbf16> to vector<64x32xbf16>
    %cst_120 = arith.constant dense<0.000000e+00> : vector<1x32xf32>
    %136 = tpu.matmul %133, %135, %cst_120 {dimension_numbers = #tpu.dot_dimension_numbers<[1], [0], [0], [1], [0, 0, 1, 1], [], []>} : vector<1x64xbf16>, vector<64x32xbf16>, vector<1x32xf32> -> vector<1x32xf32>
    %137 = arith.addf %132, %136 : vector<1x32xf32>
    %138 = vector.extract_strided_slice %103 {offsets = [7, 0], sizes = [1, 64], strides = [1, 1]} : vector<8x64xbf16> to vector<1x64xbf16>
    %c7_121 = arith.constant 7 : index
    %c0_122 = arith.constant 0 : index
    %c0_123 = arith.constant 0 : index
    %139 = vector.load %arg8[%c7_121, %c0_122, %c0_123] : memref<8x64x32xbf16, #tpu.memory_space<vmem>>, vector<1x64x32xbf16>
    %140 = vector.shape_cast %139 : vector<1x64x32xbf16> to vector<64x32xbf16>
    %cst_124 = arith.constant dense<0.000000e+00> : vector<1x32xf32>
    %141 = tpu.matmul %138, %140, %cst_124 {dimension_numbers = #tpu.dot_dimension_numbers<[1], [0], [0], [1], [0, 0, 1, 1], [], []>} : vector<1x64xbf16>, vector<64x32xbf16>, vector<1x32xf32> -> vector<1x32xf32>
    %142 = arith.addf %137, %141 : vector<1x32xf32>
    %c0_125 = arith.constant 0 : index
    %c0_126 = arith.constant 0 : index
    %143 = vector.load %arg9[%c0_125, %c0_126] : memref<1x32xf32, #tpu.memory_space<vmem>>, vector<1x32xf32>
    %144 = arith.addf %142, %143 : vector<1x32xf32>
    %c0_127 = arith.constant 0 : index
    %c0_128 = arith.constant 0 : index
    %c0_129 = arith.constant 0 : index
    %145 = vector.load %arg10[%c0_127, %c0_128, %c0_129] : memref<1x1x32xf32, #tpu.memory_space<vmem>>, vector<1x1x32xf32>
    %146 = vector.shape_cast %145 : vector<1x1x32xf32> to vector<1x32xf32>
    %147 = vector.shape_cast %144 : vector<1x32xf32> to vector<1x1x32xf32>
    tpu.vector_store %arg10[%c0_127, %c0_128, %c0_129], %147 {strides = array<i32>} : memref<1x1x32xf32, #tpu.memory_space<vmem>>, vector<1x1x32xf32>,
    return
  }
  func.func @transform_0(%arg0: i32) -> (i32, i32, i32) {
    %c0_i32 = arith.constant 0 : i32
    %c0_i32_0 = arith.constant 0 : i32
    %c0_i32_1 = arith.constant 0 : i32
    return %arg0, %c0_i32, %c0_i32_0 : i32, i32, i32
  }
  func.func @transform_1(%arg0: i32) -> (i32, i32, i32) {
    %c0_i32 = arith.constant 0 : i32
    %c0_i32_0 = arith.constant 0 : i32
    %c0_i32_1 = arith.constant 0 : i32
    %c0_i32_2 = arith.constant 0 : i32
    return %c0_i32, %c0_i32_0, %c0_i32_1 : i32, i32, i32
  }
  func.func @transform_2(%arg0: i32) -> (i32, i32, i32) {
    %c0_i32 = arith.constant 0 : i32
    %c0_i32_0 = arith.constant 0 : i32
    %c0_i32_1 = arith.constant 0 : i32
    %c0_i32_2 = arith.constant 0 : i32
    return %c0_i32, %c0_i32_0, %c0_i32_1 : i32, i32, i32
  }
  func.func @transform_3(%arg0: i32) -> (i32, i32) {
    %c0_i32 = arith.constant 0 : i32
    %c0_i32_0 = arith.constant 0 : i32
    %c0_i32_1 = arith.constant 0 : i32
    return %c0_i32, %c0_i32_0 : i32, i32
  }
  func.func @transform_4(%arg0: i32) -> (i32, i32, i32) {
    %c0_i32 = arith.constant 0 : i32
    %c0_i32_0 = arith.constant 0 : i32
    %c0_i32_1 = arith.constant 0 : i32
    %c0_i32_2 = arith.constant 0 : i32
    return %c0_i32, %c0_i32_0, %c0_i32_1 : i32, i32, i32
  }
  func.func @transform_5(%arg0: i32) -> (i32, i32, i32) {
    %c0_i32 = arith.constant 0 : i32
    %c0_i32_0 = arith.constant 0 : i32
    %c0_i32_1 = arith.constant 0 : i32
    %c0_i32_2 = arith.constant 0 : i32
    return %c0_i32, %c0_i32_0, %c0_i32_1 : i32, i32, i32
  }
  func.func @transform_6(%arg0: i32) -> (i32, i32) {
    %c0_i32 = arith.constant 0 : i32
    %c0_i32_0 = arith.constant 0 : i32
    %c0_i32_1 = arith.constant 0 : i32
    return %c0_i32, %c0_i32_0 : i32, i32
  }
  func.func @transform_7(%arg0: i32) -> (i32, i32, i32) {
    %c0_i32 = arith.constant 0 : i32
    %c0_i32_0 = arith.constant 0 : i32
    %c0_i32_1 = arith.constant 0 : i32
    %c0_i32_2 = arith.constant 0 : i32
    return %c0_i32, %c0_i32_0, %c0_i32_1 : i32, i32, i32
  }
  func.func @transform_8(%arg0: i32) -> (i32, i32) {
    %c0_i32 = arith.constant 0 : i32
    %c0_i32_0 = arith.constant 0 : i32
    %c0_i32_1 = arith.constant 0 : i32
    return %c0_i32, %c0_i32_0 : i32, i32
  }
  func.func @transform_9(%arg0: i32) -> (i32, i32, i32) {
    %c0_i32 = arith.constant 0 : i32
    %c0_i32_0 = arith.constant 0 : i32
    %c0_i32_1 = arith.constant 0 : i32
    return %arg0, %c0_i32, %c0_i32_0 : i32, i32, i32
  }
}

</mosaic_0001>

<bundles_post_ra>
// kernel: quantwrapper_forward.1
= control target key start
LH: loop header
LB: loop body
LE: loop exit
PB: predicated region body
PF: predicated region fallthrough
CT: control target
= control target key end

     0   :  { %14 = vsyncpa [#allocation3], 0  ;;  %s4068_s0 = inlined_call_operand.vmem [shape: bf16[2,8,64], index: 0, kind: input, shape index: {}]   ;;  %s4069_s1 = inlined_call_operand.vmem [shape: bf16[9,8,8], index: 1, kind: input, shape index: {}]   ;;  %s4070_s2 = inlined_call_operand.vmem [shape: bf16[9,64,64], index: 2, kind: input, shape index: {}]   ;;  %s4071_s3 = inlined_call_operand.vmem [shape: f32[8,1], index: 3, kind: input, shape index: {}]   ;;  %s4072_s4 = inlined_call_operand.vmem [shape: bf16[3,8,8], index: 4, kind: input, shape index: {}]   ;;  %s4073_s5 = inlined_call_operand.vmem [shape: bf16[3,64,64], index: 5, kind: input, shape index: {}]   ;;  %s4074_s6 = inlined_call_operand.vmem [shape: f32[8,1], index: 6, kind: input, shape index: {}]   ;;  %s4075_s7 = inlined_call_operand.vmem [shape: bf16[8,64,32], index: 7, kind: input, shape index: {}]   ;;  %s4076_s8 = inlined_call_operand.vmem [shape: f32[1,32], index: 8, kind: input, shape index: {}]   ;;  %s4077_s9 = inlined_call_operand.hbm [shape: f32[2,1,32], index: 9, kind: output, shape index: {}]  }
   0x1   :  { %16 = vsyncpa [#allocation3 + $0x1], 0  ;;  %s3459_s30 = smov 0   ;;  %s3461_s10 = smov 0  }
   0x2   :  { %s3463_s11 = smov 0   ;;  %s3465_s12 = smov 0  }
   0x3 LB: > { %s3480_s13 = sadd.s32 4294967295, %s3403_s12   ;;  %s2516_s14 = sadd.s32 4294967294, %s3403_s12   ;;  %s3403_s12 = sphi %s3465_s12, %s4083_s12   ;;  %s3399_s11 = sphi %s3463_s11, %s4082_s11   ;;  %s3395_s10 = sphi %s3461_s10, %s4081_s10   ;;  %s3391_s30 = sphi %s3459_s30, %s4080_s30  }
   0x4   : > { %s3484_s15 = sadd.s32 1, %s3403_s12   ;;  %s223_s16 = sadd.s32 1, %s3399_s11 }
   0x5   : > { %s220_s17 = ssub.s32 %s3403_s12, %s3484_s15  ;;  %p233_p0 = scmp.ne.s32.totalorder %s3399_s11, %s3395_s10 }
   0x6   : > { %p221_p1 = scmp.eq.s32.totalorder %s220_s17, 0  ;;  %p234_p2 = scmp.eq.s32.totalorder %s3480_s13, 1 }
   0x7   : > { %p239_p3 = scmp.ne.s32.totalorder %s3395_s10, %s3391_s30  ;;  %p240_p4 = scmp.eq.s32.totalorder %s2516_s14, 1 }
   0x8   : > { %s3495_s18 = scalar_select %p221_p1, %s3399_s11, %s223_s16  }
   0x9   : > { %p3497_p5 = por %p234_p2, %p233_p0  ;;  %p3501_p6 = por %p240_p4, %p239_p3 }
   0xa   : > { %p2519_p7 = scmp.ge.s32.totalorder %s3403_s12, 1  ;;  %p289_p8 = scmp.lt.s32.totalorder %s3403_s12, 3 }
   0xc   : > { %p290_p9 = pnand %p2519_p7, %p289_p8 }
   0xd   : > { %v3261_v0 = vld [vmem:[%s4070_s2 + $0x20] sm:$0xff] (!%p290_p9)   ;;  %v3405_v1 = vmov (!%p290_p9), 0.0   ;;  %v3263_v3 = vld [vmem:[%s4070_s2 + $0x28] sm:$0xff] (!%p290_p9)   ;;  %vm3406_vm0 = vmmov (!%p290_p9), 0   ;;  %p323_p10 = scmp.lt.s32.totalorder (!%p290_p9), %s3480_s13, 1  ;;  %v3265_v5 = vld [vmem:[%s4070_s2 + $0x30] sm:$0xff] (!%p290_p9)  }
   0xe   : > { %293 = sbr.rel (%p290_p9) target bundleno = 3056 (0xbf0), region = 56  ;;  %2918 = vmatprep.subr.bf16.mxu1 (!%p290_p9), %v3405_v1  ;;  %2906 = vmatprep.subr.bf16.mxu0 (!%p290_p9), %v3405_v1  ;;  %v3262_v2 = vld [vmem:[%s4070_s2] sm:$0xff] (!%p290_p9)   ;;  %v3264_v4 = vld [vmem:[%s4070_s2 + $0x8] sm:$0xff] (!%p290_p9)   ;;  %v3266_v6 = vld [vmem:[%s4070_s2 + $0x10] sm:$0xff] (!%p290_p9)   ;;  %vm361_vm1 = vcmask (!%p290_p9), 523264   ;;  %vm487_vm2 = vcmask (!%p290_p9), 1043456  }
   0xf   : > { %2919 = vmatpush3.bf16.msra.mxu1 (!%p290_p9), %v3261_v0  ;;  %2926 = vmatprep.mubr.msk.bf16.mxu1 (!%p290_p9), %vm3406_vm0, %v3405_v1  ;;  %v3267_v7 = vld [vmem:[%s4070_s2 + $0x38] sm:$0xff] (!%p290_p9)   ;;  %v2539_v21 = vld [vmem:[%s4069_s1 + $0x4] sm:$0xf] (!%p290_p9)  ;;  %vm483_vm3 = vcmask (!%p290_p9), 64512   ;;  %v406_v24 = vld [vmem:[%s4069_s1] sm:$0xf] (!%p290_p9) }
  0x10   : > { %2907 = vmatpush3.bf16.msra.mxu0 (!%p290_p9), %v3262_v2  ;;  %2920 = vmatprep.subr.bf16.mxu1 (!%p290_p9), %v3405_v1  ;;  %v3268_v8 = vld [vmem:[%s4070_s2 + $0x18] sm:$0xff] (!%p290_p9)   ;;  %v3269_v22 = vld [vmem:[%s4070_s2 + $0x40] sm:$0xff] (!%p290_p9)   ;;  %v3270_v25 = vld [vmem:[%s4070_s2 + $0x48] sm:$0xff] (!%p290_p9)   ;;  %s321_s22 = sand.u32 (!%p290_p9), 1, %s3395_s10   ;;  %s2779_s25 = sshll.u32 (!%p290_p9), %s3480_s13, 4  ;;  %vm2446_vm4 = vcmask (!%p290_p9), 253952  }
  0x11   : > { %2908 = vmatprep.subr.bf16.mxu0 (!%p290_p9), %v3405_v1  ;;  %2914 = vmatprep.mubr.msk.bf16.mxu0 (!%p290_p9), %vm3406_vm0, %v3405_v1  ;;  %v3271_v26 = vld [vmem:[%s4070_s2 + $0x50] sm:$0xff] (!%p290_p9)   ;;  %v3272_v27 = vld [vmem:[%s4070_s2 + $0x58] sm:$0xff] (!%p290_p9)   ;;  %v2555_v43 = vld [vmem:[%s4069_s1 + $0x8] sm:$0xf] (!%p290_p9)  ;;  %s322_s26 = scalar_lea.vmem (!%p290_p9), [#allocation2], %s321_s22  ;;  %s4026_s14 = scalar_lea.hbm (!%p290_p9), %s4077_s9, %s2779_s25 }
  0x12   : > { %v3273_v44 = vld [vmem:[%s4070_s2 + $0x60] sm:$0xff] (!%p290_p9)   ;;  %v3274_v45 = vld [vmem:[%s4070_s2 + $0x68] sm:$0xff] (!%p290_p9)   ;;  %v3275_v46 = vld [vmem:[%s4070_s2 + $0x70] sm:$0xff] (!%p290_p9)   ;;  %s2461_s27 = sshll.u32 (!%p290_p9), %s322_s26, 4  ;;  %s2449_s16 = scalar_lea.sflag (!%p290_p9), [#allocation3], %s321_s22  ;;  %s4028_s27 = int_to_ptr.vmem [resolvable:$true] %s2461_s27 }
  0x13   : > { %2921 = vmatpush3.bf16.msra.mxu1 (!%p290_p9), %v3263_v3  ;;  %v3276_v47 = vld [vmem:[%s4070_s2 + $0x78] sm:$0xff] (!%p290_p9)   ;;  %v2570_v59 = vld [vmem:[%s4069_s1 + $0xc] sm:$0xf] (!%p290_p9)  ;;  %v3277_v60 = vld [vmem:[%s4070_s2 + $0x80] sm:$0xff] (!%p290_p9)  }
  0x14   : > { %2909 = vmatpush3.bf16.msra.mxu0 (!%p290_p9), %v3264_v4  ;;  %2922 = vmatprep.subr.bf16.mxu1 (!%p290_p9), %v3405_v1  ;;  %v3278_v61 = vld [vmem:[%s4070_s2 + $0x88] sm:$0xff] (!%p290_p9)   ;;  %v3279_v62 = vld [vmem:[%s4070_s2 + $0x90] sm:$0xff] (!%p290_p9)   ;;  %v3280_v63 = vld [vmem:[%s4070_s2 + $0x98] sm:$0xff] (!%p290_p9)  }
  0x15   : > { %s324_s29 = scalar_select %p323_p10, %s3480_s13, 1  ;;  %2910 = vmatprep.subr.bf16.mxu0 %v3405_v1 }
  0x16   : > { %s3408_s13 = smov [#allocation2]  }
  0x17   : > { %s2520_s17 = sshll.u32 %s324_s29, 2  ;;  %2923 = vmatpush3.bf16.msra.mxu1 %v3265_v5  ;;  %s3345_s21 = sshll.u32 %s3408_s13, 4  ;;  %s3346_s21 = int_to_ptr.vmem [resolvable:$false] %s3345_s21 }
  0x18   : > { %s326_s29 = scalar_lea.vmem %s4068_s0, %s2520_s17  ;;  %2911 = vmatpush3.bf16.msra.mxu0 %v3266_v6  ;;  %2924 = vmatprep.subr.bf16.mxu1 %v3405_v1  ;;  %s3341_s17 = scalar_lea.vmem %s4028_s27, 16 }
  0x19   : > { %2912 = vmatprep.subr.bf16.mxu0 %v3405_v1  ;;  %v3548_v9 = vld [vmem:[%s326_s29] sm:$0xf]  ;;  %p3342_p11 = scmp.ne.s32.totalorder %s4028_s27, %s3341_s17  ;;  %s3347_s23 = scalar_lea.vmem %s3346_s21, 32 }
  0x1a   : > { %p3348_p0 = scmp.lt.s32.totalorder %s4028_s27, %s3346_s21  ;;  %p3349_p1 = scmp.lt.s32.totalorder %s3347_s23, %s3341_s17 }
  0x1b   : > { %2925 = vmatpush3.bf16.msra.mxu1 %v3267_v7  ;;  %p3343_p12 = pnand %p3342_p11, %p3497_p5 }
  0x1c   : > { %2913 = vmatpush3.bf16.msra.mxu0 %v3268_v8  ;;  %2936 = vmatprep.subr.bf16.mxu1 %v3405_v1  ;;  %p3350_p2 = por %p3349_p1, %p3348_p0 }
  0x1d   : > { %2930 = vmatprep.subr.bf16.mxu0 %v3405_v1  ;;  %p3344_p13 = pneg %p3343_p12 }
  0x1e   : > { %2927 = vmatmul.mubr.msk.bf16.vlgmr.msra.gmra.mrb[0].mxu1 %vm361_vm1, %v3548_v9 }
  0x1f   : > { %2915 = vmatmul.mubr.msk.bf16.vlgmr.msra.gmra.mrb[0].mxu0 %vm361_vm1, %v3548_v9  ;;  %2938 = vmatprep.mubr.msk.bf16.mxu1 %vm3406_vm0, %v3405_v1  ;;  %p3351_p3 = pnand %p3350_p2, %p3344_p13 }
  0x20   : > { %2932 = vmatprep.mubr.msk.bf16.mxu0 %vm3406_vm0, %v3405_v1 }
  0xf1   : > { %v474_v10 = vpop.f32.mrb[0].mxu1 }
  0xf2   : > { %v480_v11 = vpack.c.bf16 %v474_v10, %v474_v10  ;;  %v399_v12 = vpop.f32.mrb[0].mxu0  ;;  %v2928_v13 = vpop.f32.mrb[1].mxu1 }
  0xf3   : > { %v405_v14 = vpack.c.bf16 %v399_v12, %v399_v12  ;;  %v477_v15 = vpop.f32.mrb[2].mxu1  ;;  %v2916_v16 = vpop.f32.mrb[1].mxu0  ;;  %v2585_v13 = vld [vmem:[%s4069_s1 + $0x10] sm:$0xf] }
  0xf4   : > { %v489_v17 = vsel %vm487_vm2, %v480_v11, 0  ;;  %v2929_v18 = vpop.f32.mrb[3].mxu1  ;;  %v402_v19 = vpop.f32.mrb[2].mxu0  ;;  %v3282_v15 = vld [vmem:[%s4070_s2 + $0xa8] sm:$0xff]   ;;  %v3283_v16 = vld [vmem:[%s4070_s2 + $0xb0] sm:$0xff]  }
  0xf5   : > { %v535_v20 = vsel %vm487_vm2, %v405_v14, 0  ;;  %2931 = vmatpush3.bf16.msra.mxu0 %v489_v17  ;;  %v2917_v23 = vpop.f32.mrb[3].mxu0  ;;  %v3281_v14 = vld [vmem:[%s4070_s2 + $0xa0] sm:$0xff]   ;;  %v3284_v17 = vld [vmem:[%s4070_s2 + $0xb8] sm:$0xff]  }
  0xf6   : > { %2937 = vmatpush3.bf16.msra.mxu1 %v535_v20  ;;  %2942 = vmatprep.subr.bf16.mxu0 %v3405_v1 }
  0xf7   : > { %2954 = vmatprep.subr.bf16.mxu1 %v3405_v1 }
  0xf8   : > { %2933 = vmatmul.mubr.msk.bf16.vlgmr.msra.gmra.mrb[4].mxu0 %vm483_vm3, %v2539_v21 }
  0xf9   : > { %2939 = vmatmul.mubr.msk.bf16.vlgmr.msra.gmra.mrb[4].mxu1 %vm483_vm3, %v406_v24  ;;  %2943 = vmatpush3.bf16.msra.mxu0 %v3269_v22 }
  0xfa   : > { %2944 = vmatprep.subr.bf16.mxu0 %v3405_v1  ;;  %2950 = vmatprep.mubr.msk.bf16.mxu0 %vm3406_vm0, %v3405_v1 }
  0xfb   : > { %2956 = vmatprep.mubr.msk.bf16.mxu1 %vm3406_vm0, %v3405_v1 }
  0xfd   : > { %2945 = vmatpush3.bf16.msra.mxu0 %v3270_v25 }
  0xfe   : > { %2946 = vmatprep.subr.bf16.mxu0 %v3405_v1 }
 0x101   : > { %2947 = vmatpush3.bf16.msra.mxu0 %v3271_v26 }
 0x102   : > { %2948 = vmatprep.subr.bf16.mxu0 %v3405_v1 }
 0x105   : > { %2949 = vmatpush3.bf16.msra.mxu0 %v3272_v27 }
 0x106   : > { %2972 = vmatprep.subr.bf16.mxu0 %v3405_v1 }
 0x108   : > { %2951 = vmatmul.mubr.msk.bf16.vlgmr.msra.gmra.mrb[8].mxu0 %vm361_vm1, %v3548_v9 }
 0x109   : > { %2974 = vmatprep.mubr.msk.bf16.mxu0 %vm3406_vm0, %v3405_v1 }
 0x1cb   : > { %v525_v28 = vpop.f32.mrb[4].mxu0 }
 0x1cc   : > { %v2934_v29 = vpop.f32.mrb[5].mxu0  ;;  %v571_v30 = vpop.f32.mrb[4].mxu1 }
 0x1cd   : > { %v572_v31 = vadd.f32 %v571_v30, %v525_v28  ;;  %v528_v32 = vpop.f32.mrb[6].mxu0  ;;  %v2940_v33 = vpop.f32.mrb[5].mxu1  ;;  %v2600_v29 = vld [vmem:[%s4069_s1 + $0x14] sm:$0xf]  ;;  %v3285_v30 = vld [vmem:[%s4070_s2 + $0xc0] sm:$0xff]  }
 0x1ce   : > { %v2935_v34 = vpop.f32.mrb[7].mxu0  ;;  %v574_v35 = vpop.f32.mrb[6].mxu1  ;;  %v3287_v32 = vld [vmem:[%s4070_s2 + $0xd0] sm:$0xff]   ;;  %v3288_v33 = vld [vmem:[%s4070_s2 + $0xd8] sm:$0xff]  }
 0x1cf   : > { %v2941_v36 = vpop.f32.mrb[7].mxu1 }
 0x1db   : > { %v644_v37 = vpop.f32.mrb[8].mxu0 }
 0x1dc   : > { %v650_v38 = vpack.c.bf16 %v644_v37, %v644_v37  ;;  %v2952_v39 = vpop.f32.mrb[9].mxu0 }
 0x1dd   : > { %v647_v40 = vpop.f32.mrb[10].mxu0 }
 0x1de   : > { %v657_v41 = vsel %vm487_vm2, %v650_v38, 0  ;;  %v2953_v42 = vpop.f32.mrb[11].mxu0 }
 0x1df   : > { %2955 = vmatpush3.bf16.msra.mxu1 %v657_v41 }
 0x1e0   : > { %2960 = vmatprep.subr.bf16.mxu1 %v3405_v1 }
 0x1e2   : > { %2957 = vmatmul.mubr.msk.bf16.vlgmr.msra.gmra.mrb[8].mxu1 %vm483_vm3, %v2555_v43 }
 0x1e3   : > { %2961 = vmatpush3.bf16.msra.mxu1 %v3273_v44  ;;  %2968 = vmatprep.mubr.msk.bf16.mxu1 %vm3406_vm0, %v3405_v1 }
 0x1e4   : > { %2962 = vmatprep.subr.bf16.mxu1 %v3405_v1 }
 0x1e7   : > { %2963 = vmatpush3.bf16.msra.mxu1 %v3274_v45  ;;  %v2615_v45 = vld [vmem:[%s4069_s1 + $0x18] sm:$0xf] }
 0x1e8   : > { %2964 = vmatprep.subr.bf16.mxu1 %v3405_v1 }
 0x1eb   : > { %2965 = vmatpush3.bf16.msra.mxu1 %v3275_v46  ;;  %v3289_v46 = vld [vmem:[%s4070_s2 + $0xe0] sm:$0xff]  }
 0x1ec   : > { %2966 = vmatprep.subr.bf16.mxu1 %v3405_v1 }
 0x1ef   : > { %2967 = vmatpush3.bf16.msra.mxu1 %v3276_v47  ;;  %v3290_v47 = vld [vmem:[%s4070_s2 + $0xe8] sm:$0xff]  }
 0x1f0   : > { %2990 = vmatprep.subr.bf16.mxu1 %v3405_v1 }
 0x1f2   : > { %2969 = vmatmul.mubr.msk.bf16.vlgmr.msra.gmra.mrb[12].mxu1 %vm361_vm1, %v3548_v9 }
 0x1f3   : > { %2992 = vmatprep.mubr.msk.bf16.mxu1 %vm3406_vm0, %v3405_v1 }
 0x2b5   : > { %v693_v48 = vpop.f32.mrb[8].mxu1 }
 0x2b6   : > { %v699_v49 = vadd.f32 %v693_v48, %v572_v31  ;;  %v2958_v50 = vpop.f32.mrb[9].mxu1  ;;  %v3286_v31 = vld [vmem:[%s4070_s2 + $0xc8] sm:$0xff]   ;;  %v3291_v48 = vld [vmem:[%s4070_s2 + $0xf0] sm:$0xff]  }
 0x2b7   : > { %v696_v51 = vpop.f32.mrb[10].mxu1 }
 0x2b8   : > { %v2959_v52 = vpop.f32.mrb[11].mxu1 }
 0x2c5   : > { %v767_v53 = vpop.f32.mrb[12].mxu1 }
 0x2c6   : > { %v773_v54 = vpack.c.bf16 %v767_v53, %v767_v53  ;;  %v2970_v55 = vpop.f32.mrb[13].mxu1 }
 0x2c7   : > { %v770_v56 = vpop.f32.mrb[14].mxu1 }
 0x2c8   : > { %v780_v57 = vsel %vm487_vm2, %v773_v54, 0  ;;  %v2971_v58 = vpop.f32.mrb[15].mxu1 }
 0x2c9   : > { %2973 = vmatpush3.bf16.msra.mxu0 %v780_v57 }
 0x2ca   : > { %2978 = vmatprep.subr.bf16.mxu0 %v3405_v1 }
 0x2cc   : > { %2975 = vmatmul.mubr.msk.bf16.vlgmr.msra.gmra.mrb[12].mxu0 %vm483_vm3, %v2570_v59 }
 0x2cd   : > { %2979 = vmatpush3.bf16.msra.mxu0 %v3277_v60  ;;  %2986 = vmatprep.mubr.msk.bf16.mxu0 %vm3406_vm0, %v3405_v1 }
 0x2ce   : > { %2980 = vmatprep.subr.bf16.mxu0 %v3405_v1 }
 0x2d1   : > { %2981 = vmatpush3.bf16.msra.mxu0 %v3278_v61  ;;  %v2630_v61 = vld [vmem:[%s4069_s1 + $0x1c] sm:$0xf] }
 0x2d2   : > { %2982 = vmatprep.subr.bf16.mxu0 %v3405_v1 }
 0x2d5   : > { %2983 = vmatpush3.bf16.msra.mxu0 %v3279_v62  ;;  %v3293_v62 = vld [vmem:[%s4070_s2 + $0x100] sm:$0xff]  }
 0x2d6   : > { %2984 = vmatprep.subr.bf16.mxu0 %v3405_v1 }
 0x2d9   : > { %2985 = vmatpush3.bf16.msra.mxu0 %v3280_v63  ;;  %v3294_v63 = vld [vmem:[%s4070_s2 + $0x108] sm:$0xff]  }
 0x2da   : > { %3008 = vmatprep.subr.bf16.mxu0 %v3405_v1 }
 0x2dc   : > { %2987 = vmatmul.mubr.msk.bf16.vlgmr.msra.gmra.mrb[16].mxu0 %vm361_vm1, %v3548_v9 }
 0x2dd   : > { %3010 = vmatprep.mubr.msk.bf16.mxu0 %vm3406_vm0, %v3405_v1 }
 0x39f   : > { %v816_v0 = vpop.f32.mrb[12].mxu0 }
 0x3a0   : > { %v822_v2 = vadd.f32 %v816_v0, %v699_v49  ;;  %v2976_v3 = vpop.f32.mrb[13].mxu0  ;;  %v3292_v49 = vld [vmem:[%s4070_s2 + $0xf8] sm:$0xff]   ;;  %v3295_v0 = vld [vmem:[%s4070_s2 + $0x110] sm:$0xff]  }
 0x3a1   : > { %v819_v4 = vpop.f32.mrb[14].mxu0  ;;  %v1438_v3 = vld [vmem:[%s4071_s3] sm:$0xff] }
 0x3a2   : > { %v2977_v5 = vpop.f32.mrb[15].mxu0  ;;  %v3407_v4 = vmov 0  }
 0x3a3   : > { %3260 = vset.pattern.permute.xlu0 %v3407_v4  ;;  %v3298_v5 = vld [vmem:[%s4073_s5 + $0x20] sm:$0xff]  }
 0x3a4   : > { %1441 = vperm.xlu0 %3260, %v1438_v3  }
 0x3af   : > { %v890_v6 = vpop.f32.mrb[16].mxu0 }
 0x3b0   : > { %v896_v7 = vpack.c.bf16 %v890_v6, %v890_v6  ;;  %v2988_v8 = vpop.f32.mrb[17].mxu0  ;;  %v1814_v6 = vld [vmem:[%s4074_s6] sm:$0xff] }
 0x3b1   : > { %v893_v10 = vpop.f32.mrb[18].mxu0  ;;  %1817 = vperm.xlu0 %3260, %v1814_v6  }
 0x3b2   : > { %v903_v11 = vsel %vm487_vm2, %v896_v7, 0  ;;  %v2989_v12 = vpop.f32.mrb[19].mxu0 }
 0x3b3   : > { %2991 = vmatpush3.bf16.msra.mxu1 %v903_v11 }
 0x3b4   : > { %2996 = vmatprep.subr.bf16.mxu1 %v3405_v1 }
 0x3b6   : > { %2993 = vmatmul.mubr.msk.bf16.vlgmr.msra.gmra.mrb[16].mxu1 %vm483_vm3, %v2585_v13 }
 0x3b7   : > { %2997 = vmatpush3.bf16.msra.mxu1 %v3281_v14  ;;  %3004 = vmatprep.mubr.msk.bf16.mxu1 %vm3406_vm0, %v3405_v1 }
 0x3b8   : > { %2998 = vmatprep.subr.bf16.mxu1 %v3405_v1 }
 0x3bb   : > { %2999 = vmatpush3.bf16.msra.mxu1 %v3282_v15 }
 0x3bc   : > { %3000 = vmatprep.subr.bf16.mxu1 %v3405_v1 }
 0x3bf   : > { %3001 = vmatpush3.bf16.msra.mxu1 %v3283_v16 }
 0x3c0   : > { %3002 = vmatprep.subr.bf16.mxu1 %v3405_v1 }
 0x3c3   : > { %3003 = vmatpush3.bf16.msra.mxu1 %v3284_v17 }
 0x3c4   : > { %3026 = vmatprep.subr.bf16.mxu1 %v3405_v1 }
 0x3c6   : > { %3005 = vmatmul.mubr.msk.bf16.vlgmr.msra.gmra.mrb[20].mxu1 %vm361_vm1, %v3548_v9 }
 0x3c7   : > { %3028 = vmatprep.mubr.msk.bf16.mxu1 %vm3406_vm0, %v3405_v1 }
 0x489   : > { %v939_v18 = vpop.f32.mrb[16].mxu1 }
 0x48a   : > { %v945_v19 = vadd.f32 %v939_v18, %v822_v2  ;;  %v2994_v20 = vpop.f32.mrb[17].mxu1  ;;  %v3296_v2 = vld [vmem:[%s4070_s2 + $0x118] sm:$0xff]  }
 0x48b   : > { %v942_v21 = vpop.f32.mrb[18].mxu1  ;;  %v3297_v20 = vld [vmem:[%s4073_s5] sm:$0xff]  }
 0x48c   : > { %v2995_v22 = vpop.f32.mrb[19].mxu1  ;;  %v3299_v21 = vld [vmem:[%s4073_s5 + $0x8] sm:$0xff]  }
 0x48d   : > { %v3301_v22 = vld [vmem:[%s4073_s5 + $0x10] sm:$0xff]  }
 0x499   : > { %v1013_v23 = vpop.f32.mrb[20].mxu1 }
 0x49a   : > { %v1019_v24 = vpack.c.bf16 %v1013_v23, %v1013_v23  ;;  %v3006_v25 = vpop.f32.mrb[21].mxu1  ;;  %v3302_v23 = vld [vmem:[%s4073_s5 + $0x30] sm:$0xff]  }
 0x49b   : > { %v1016_v26 = vpop.f32.mrb[22].mxu1  ;;  %v3304_v25 = vld [vmem:[%s4073_s5 + $0x38] sm:$0xff]  }
 0x49c   : > { %v1026_v27 = vsel %vm487_vm2, %v1019_v24, 0  ;;  %v3007_v28 = vpop.f32.mrb[23].mxu1  ;;  %v3303_v24 = vld [vmem:[%s4073_s5 + $0x18] sm:$0xff]  }
 0x49d   : > { %3009 = vmatpush3.bf16.msra.mxu0 %v1026_v27 }
 0x49e   : > { %3014 = vmatprep.subr.bf16.mxu0 %v3405_v1 }
 0x4a0   : > { %3011 = vmatmul.mubr.msk.bf16.vlgmr.msra.gmra.mrb[20].mxu0 %vm483_vm3, %v2600_v29  ;;  %v1442_v29 = vpop.permute.xlu0 %1441 }
 0x4a1   : > { %3015 = vmatpush3.bf16.msra.mxu0 %v3285_v30  ;;  %3022 = vmatprep.mubr.msk.bf16.mxu0 %vm3406_vm0, %v3405_v1 }
 0x4a2   : > { %3016 = vmatprep.subr.bf16.mxu0 %v3405_v1 }
 0x4a5   : > { %3017 = vmatpush3.bf16.msra.mxu0 %v3286_v31 }
 0x4a6   : > { %3018 = vmatprep.subr.bf16.mxu0 %v3405_v1 }
 0x4a9   : > { %3019 = vmatpush3.bf16.msra.mxu0 %v3287_v32 }
 0x4aa   : > { %3020 = vmatprep.subr.bf16.mxu0 %v3405_v1 }
 0x4ad   : > { %3021 = vmatpush3.bf16.msra.mxu0 %v3288_v33 }
 0x4ae   : > { %3044 = vmatprep.subr.bf16.mxu0 %v3405_v1 }
 0x4b0   : > { %3023 = vmatmul.mubr.msk.bf16.vlgmr.msra.gmra.mrb[24].mxu0 %vm361_vm1, %v3548_v9 }
 0x4b1   : > { %3046 = vmatprep.mubr.msk.bf16.mxu0 %vm3406_vm0, %v3405_v1 }
 0x573   : > { %v1062_v34 = vpop.f32.mrb[20].mxu0 }
 0x574   : > { %v1068_v35 = vadd.f32 %v1062_v34, %v945_v19  ;;  %v3012_v36 = vpop.f32.mrb[21].mxu0  ;;  %v2645_v19 = vld [vmem:[%s4069_s1 + $0x20] sm:$0xf] }
 0x575   : > { %v1065_v37 = vpop.f32.mrb[22].mxu0 }
 0x576   : > { %v3013_v38 = vpop.f32.mrb[23].mxu0 }
 0x583   : > { %v1136_v39 = vpop.f32.mrb[24].mxu0 }
 0x584   : > { %v1142_v40 = vpack.c.bf16 %v1136_v39, %v1136_v39  ;;  %v3024_v41 = vpop.f32.mrb[25].mxu0 }
 0x585   : > { %v1139_v42 = vpop.f32.mrb[26].mxu0 }
 0x586   : > { %v1149_v43 = vsel %vm487_vm2, %v1142_v40, 0  ;;  %v3025_v44 = vpop.f32.mrb[27].mxu0 }
 0x587   : > { %3027 = vmatpush3.bf16.msra.mxu1 %v1149_v43 }
 0x588   : > { %3032 = vmatprep.subr.bf16.mxu1 %v3405_v1 }
 0x58a   : > { %3029 = vmatmul.mubr.msk.bf16.vlgmr.msra.gmra.mrb[24].mxu1 %vm483_vm3, %v2615_v45 }
 0x58b   : > { %3033 = vmatpush3.bf16.msra.mxu1 %v3289_v46  ;;  %3040 = vmatprep.mubr.msk.bf16.mxu1 %vm3406_vm0, %v3405_v1  ;;  %v2665_v46 = vld [vmem:[%s4072_s4 + $0x4] sm:$0xf] }
 0x58c   : > { %3034 = vmatprep.subr.bf16.mxu1 %v3405_v1 }
 0x58f   : > { %3035 = vmatpush3.bf16.msra.mxu1 %v3290_v47  ;;  %v1522_v47 = vld [vmem:[%s4072_s4] sm:$0xf] }
 0x590   : > { %3036 = vmatprep.subr.bf16.mxu1 %v3405_v1 }
 0x593   : > { %3037 = vmatpush3.bf16.msra.mxu1 %v3291_v48  ;;  %v3305_v48 = vld [vmem:[%s4073_s5 + $0x40] sm:$0xff]  }
 0x594   : > { %3038 = vmatprep.subr.bf16.mxu1 %v3405_v1 }
 0x597   : > { %3039 = vmatpush3.bf16.msra.mxu1 %v3292_v49  ;;  %v3306_v49 = vld [vmem:[%s4073_s5 + $0x48] sm:$0xff]  }
 0x598   : > { %3062 = vmatprep.subr.bf16.mxu1 %v3405_v1 }
 0x59a   : > { %3041 = vmatmul.mubr.msk.bf16.vlgmr.msra.gmra.mrb[28].mxu1 %vm361_vm1, %v3548_v9 }
 0x59b   : > { %3064 = vmatprep.mubr.msk.bf16.mxu1 %vm3406_vm0, %v3405_v1 }
 0x65d   : > { %v1185_v50 = vpop.f32.mrb[24].mxu1 }
 0x65e   : > { %v1191_v51 = vadd.f32 %v1185_v50, %v1068_v35  ;;  %v3030_v52 = vpop.f32.mrb[25].mxu1  ;;  %v3307_v50 = vld [vmem:[%s4073_s5 + $0x50] sm:$0xff]  }
 0x65f   : > { %v1188_v53 = vpop.f32.mrb[26].mxu1  ;;  %v3309_v52 = vld [vmem:[%s4075_s7] sm:$0xff]  }
 0x660   : > { %v3031_v54 = vpop.f32.mrb[27].mxu1  ;;  %v3311_v53 = vld [vmem:[%s4075_s7 + $0x8] sm:$0xff]  }
 0x661   : > { %v3313_v54 = vld [vmem:[%s4075_s7 + $0x10] sm:$0xff]  }
 0x66d   : > { %v1259_v55 = vpop.f32.mrb[28].mxu1 }
 0x66e   : > { %v1265_v56 = vpack.c.bf16 %v1259_v55, %v1259_v55  ;;  %v3042_v57 = vpop.f32.mrb[29].mxu1 }
 0x66f   : > { %v1262_v58 = vpop.f32.mrb[30].mxu1 }
 0x670   : > { %v1272_v59 = vsel %vm487_vm2, %v1265_v56, 0  ;;  %v3043_v60 = vpop.f32.mrb[31].mxu1 }
 0x671   : > { %3045 = vmatpush3.bf16.msra.mxu0 %v1272_v59 }
 0x672   : > { %3050 = vmatprep.subr.bf16.mxu0 %v3405_v1 }
 0x674   : > { %3047 = vmatmul.mubr.msk.bf16.vlgmr.msra.gmra.mrb[28].mxu0 %vm483_vm3, %v2630_v61 }
 0x675   : > { %3051 = vmatpush3.bf16.msra.mxu0 %v3293_v62  ;;  %3058 = vmatprep.mubr.msk.bf16.mxu0 %vm3406_vm0, %v3405_v1 }
 0x676   : > { %3052 = vmatprep.subr.bf16.mxu0 %v3405_v1 }
 0x679   : > { %3053 = vmatpush3.bf16.msra.mxu0 %v3294_v63 }
 0x67a   : > { %3054 = vmatprep.subr.bf16.mxu0 %v3405_v1 }
 0x67d   : > { %3055 = vmatpush3.bf16.msra.mxu0 %v3295_v0 }
 0x67e   : > { %3056 = vmatprep.subr.bf16.mxu0 %v3405_v1 }
 0x681   : > { %3057 = vmatpush3.bf16.msra.mxu0 %v3296_v2 }
 0x682   : > { %3080 = vmatprep.subr.bf16.mxu0 %v3405_v1 }
 0x684   : > { %3059 = vmatmul.mubr.msk.bf16.vlgmr.msra.gmra.mrb[32].mxu0 %vm361_vm1, %v3548_v9  ;;  %v3300_v9 = vld [vmem:[%s4073_s5 + $0x28] sm:$0xff]  }
 0x685   : > { %3088 = vmatprep.mubr.msk.bf16.mxu0 %vm3406_vm0, %v3405_v1  ;;  %3081 = vmatpush3.bf16.msra.mxu0 %v3298_v5 }
 0x686   : > { %3082 = vmatprep.subr.bf16.mxu0 %v3405_v1 }
 0x689   : > { %3083 = vmatpush3.bf16.msra.mxu0 %v3300_v9  ;;  %v2681_v9 = vld [vmem:[%s4072_s4 + $0x8] sm:$0xf] }
 0x68a   : > { %3084 = vmatprep.subr.bf16.mxu0 %v3405_v1 }
 0x68d   : > { %3085 = vmatpush3.bf16.msra.mxu0 %v3302_v23 }
 0x68e   : > { %3086 = vmatprep.subr.bf16.mxu0 %v3405_v1 }
 0x691   : > { %3087 = vmatpush3.bf16.msra.mxu0 %v3304_v25  ;;  %v3320_v25 = vld [vmem:[%s4075_s7 + $0x48] sm:$0xff]  }
 0x692   : > { %3098 = vmatprep.subr.bf16.mxu0 %v3405_v1 }
 0x747   : > { %v1308_v7 = vpop.f32.mrb[28].mxu0 }
 0x748   : > { %v1314_v8 = vadd.f32 %v1308_v7, %v1191_v51  ;;  %v3048_v10 = vpop.f32.mrb[29].mxu0  ;;  %v3308_v51 = vld [vmem:[%s4073_s5 + $0x58] sm:$0xff]   ;;  %v3310_v7 = vld [vmem:[%s4075_s7 + $0x20] sm:$0xff]  }
 0x749   : > { %v1311_v11 = vpop.f32.mrb[30].mxu0  ;;  %v3314_v10 = vld [vmem:[%s4075_s7 + $0x30] sm:$0xff]  }
 0x74a   : > { %v3049_v12 = vpop.f32.mrb[31].mxu0  ;;  %v3315_v11 = vld [vmem:[%s4075_s7 + $0x18] sm:$0xff]  }
 0x74b   : > { %v3316_v12 = vld [vmem:[%s4075_s7 + $0x38] sm:$0xff]  }
 0x757   : > { %v1382_v13 = vpop.f32.mrb[32].mxu0 }
 0x758   : > { %v1388_v14 = vpack.c.bf16 %v1382_v13, %v1382_v13  ;;  %v3060_v15 = vpop.f32.mrb[33].mxu0 }
 0x759   : > { %v1385_v16 = vpop.f32.mrb[34].mxu0 }
 0x75a   : > { %v1395_v17 = vsel %vm487_vm2, %v1388_v14, 0  ;;  %v3061_v18 = vpop.f32.mrb[35].mxu0  ;;  %v1818_v16 = vpop.permute.xlu0 %1817 }
 0x75b   : > { %3063 = vmatpush3.bf16.msra.mxu1 %v1395_v17 }
 0x75c   : > { %3068 = vmatprep.subr.bf16.mxu1 %v3405_v1 }
 0x75e   : > { %3065 = vmatmul.mubr.msk.bf16.vlgmr.msra.gmra.mrb[32].mxu1 %vm483_vm3, %v2645_v19 }
 0x75f   : > { %3069 = vmatpush3.bf16.msra.mxu1 %v3297_v20  ;;  %3076 = vmatprep.mubr.msk.bf16.mxu1 %vm3406_vm0, %v3405_v1  ;;  %v3317_v20 = vld [vmem:[%s4075_s7 + $0x60] sm:$0xff]  }
 0x760   : > { %3070 = vmatprep.subr.bf16.mxu1 %v3405_v1 }
 0x763   : > { %3071 = vmatpush3.bf16.msra.mxu1 %v3299_v21 }
 0x764   : > { %3072 = vmatprep.subr.bf16.mxu1 %v3405_v1 }
 0x767   : > { %3073 = vmatpush3.bf16.msra.mxu1 %v3301_v22  ;;  %v3318_v22 = vld [vmem:[%s4075_s7 + $0x40] sm:$0xff]  }
 0x768   : > { %3074 = vmatprep.subr.bf16.mxu1 %v3405_v1 }
 0x76b   : > { %3075 = vmatpush3.bf16.msra.mxu1 %v3303_v24  ;;  %v3319_v24 = vld [vmem:[%s4075_s7 + $0x68] sm:$0xff]  }
 0x76c   : > { %3092 = vmatprep.subr.bf16.mxu1 %v3405_v1 }
 0x831   : > { %v1431_v26 = vpop.f32.mrb[32].mxu1 }
 0x832   : > { %v1437_v27 = vadd.f32 %v1431_v26, %v1314_v8  ;;  %v3066_v28 = vpop.f32.mrb[33].mxu1  ;;  %v3312_v8 = vld [vmem:[%s4075_s7 + $0x28] sm:$0xff]   ;;  %v3321_v26 = vld [vmem:[%s4075_s7 + $0x70] sm:$0xff]  }
 0x833   : > { %v1434_v30 = vpop.f32.mrb[34].mxu1  ;;  %v3323_v28 = vld [vmem:[%s4075_s7 + $0x78] sm:$0xff]  }
 0x834   : > { %v1444_v31 = vadd.f32 %v1442_v29, %v1437_v27  ;;  %v3067_v32 = vpop.f32.mrb[35].mxu1  ;;  %v3322_v27 = vld [vmem:[%s4075_s7 + $0x50] sm:$0xff]   ;;  %v3324_v29 = vld [vmem:[%s4075_s7 + $0x58] sm:$0xff]   ;;  %v3325_v30 = vld [vmem:[%s4075_s7 + $0xa0] sm:$0xff]  }
 0x835   : > { %v3326_v32 = vld [vmem:[%s4075_s7 + $0x80] sm:$0xff]  }
 0x836   : > { %v1445_v33 = vpack.c.bf16 %v1444_v31, %v1444_v31 }
 0x838   : > { %3077 = vmatmul.mubr.msk.bf16.vlgmr.msra.gmra.mrb[36].mxu1 %vm361_vm1, %v1445_v33  ;;  %3089 = vmatmul.mubr.msk.bf16.vlgmr.msra.gmra.mrb[36].mxu0 %vm361_vm1, %v1445_v33 }
 0x839   : > { %3094 = vmatprep.mubr.msk.bf16.mxu1 %vm3406_vm0, %v3405_v1  ;;  %3100 = vmatprep.mubr.msk.bf16.mxu0 %vm3406_vm0, %v3405_v1 }
 0x90b   : > { %v1515_v34 = vpop.f32.mrb[36].mxu1  ;;  %v1590_v35 = vpop.f32.mrb[36].mxu0 }
 0x90c   : > { %v1521_v36 = vpack.c.bf16 %v1515_v34, %v1515_v34  ;;  %v1596_v37 = vpack.c.bf16 %v1590_v35, %v1590_v35  ;;  %v3078_v38 = vpop.f32.mrb[37].mxu1  ;;  %v3090_v39 = vpop.f32.mrb[37].mxu0  ;;  %v3327_v34 = vld [vmem:[%s4075_s7 + $0xa8] sm:$0xff]  }
 0x90d   : > { %v1518_v40 = vpop.f32.mrb[38].mxu1  ;;  %v1593_v41 = vpop.f32.mrb[38].mxu0  ;;  %v3328_v35 = vld [vmem:[%s4075_s7 + $0x88] sm:$0xff]   ;;  %v3331_v38 = vld [vmem:[%s4075_s7 + $0xb8] sm:$0xff]  }
 0x90e   : > { %v1649_v42 = vsel %vm487_vm2, %v1521_v36, 0  ;;  %v1603_v43 = vsel %vm487_vm2, %v1596_v37, 0  ;;  %v3079_v44 = vpop.f32.mrb[39].mxu1  ;;  %v3091_v45 = vpop.f32.mrb[39].mxu0  ;;  %v3329_v36 = vld [vmem:[%s4075_s7 + $0xb0] sm:$0xff]   ;;  %v3332_v39 = vld [vmem:[%s4075_s7 + $0x98] sm:$0xff]  }
 0x90f   : > { %3093 = vmatpush3.bf16.msra.mxu1 %v1603_v43  ;;  %3099 = vmatpush3.bf16.msra.mxu0 %v1649_v42  ;;  %v3330_v37 = vld [vmem:[%s4075_s7 + $0x90] sm:$0xff]   ;;  %v3333_v40 = vld [vmem:[%s4075_s7 + $0xe0] sm:$0xff]   ;;  %v3335_v44 = vld [vmem:[%s4075_s7 + $0xe8] sm:$0xff]  }
 0x910   : > { %3104 = vmatprep.subr.bf16.mxu1 %v3405_v1  ;;  %3116 = vmatprep.subr.bf16.mxu0 %v3405_v1  ;;  %v3334_v42 = vld [vmem:[%s4075_s7 + $0xc0] sm:$0xff]   ;;  %v3336_v45 = vld [vmem:[%s4075_s7 + $0xc8] sm:$0xff]  }
 0x912   : > { %3095 = vmatmul.mubr.msk.bf16.vlgmr.msra.gmra.mrb[40].mxu1 %vm483_vm3, %v2665_v46  ;;  %3101 = vmatmul.mubr.msk.bf16.vlgmr.msra.gmra.mrb[40].mxu0 %vm483_vm3, %v1522_v47  ;;  %v3337_v46 = vld [vmem:[%s4075_s7 + $0xf0] sm:$0xff]  }
 0x913   : > { %3105 = vmatpush3.bf16.msra.mxu1 %v3305_v48  ;;  %3112 = vmatprep.mubr.msk.bf16.mxu1 %vm3406_vm0, %v3405_v1  ;;  %v3338_v47 = vld [vmem:[%s4075_s7 + $0xd0] sm:$0xff]   ;;  %v3339_v48 = vld [vmem:[%s4075_s7 + $0xf8] sm:$0xff]  }
 0x914   : > { %3106 = vmatprep.subr.bf16.mxu1 %v3405_v1  ;;  %3118 = vmatprep.mubr.msk.bf16.mxu0 %vm3406_vm0, %v3405_v1 }
 0x917   : > { %3107 = vmatpush3.bf16.msra.mxu1 %v3306_v49  ;;  %v3340_v49 = vld [vmem:[%s4075_s7 + $0xd8] sm:$0xff]  }
 0x918   : > { %3108 = vmatprep.subr.bf16.mxu1 %v3405_v1 }
 0x91b   : > { %3109 = vmatpush3.bf16.msra.mxu1 %v3307_v50 }
 0x91c   : > { %3110 = vmatprep.subr.bf16.mxu1 %v3405_v1 }
 0x91f   : > { %3111 = vmatpush3.bf16.msra.mxu1 %v3308_v51 }
 0x920   : > { %3134 = vmatprep.subr.bf16.mxu1 %v3405_v1 }
 0x922   : > { %3113 = vmatmul.mubr.msk.bf16.vlgmr.msra.gmra.mrb[44].mxu1 %vm361_vm1, %v1445_v33 }
 0x923   : > { %3142 = vmatprep.mubr.msk.bf16.mxu1 %vm3406_vm0, %v3405_v1  ;;  %3135 = vmatpush3.bf16.msra.mxu1 %v3309_v52 }
 0x924   : > { %3136 = vmatprep.subr.bf16.mxu1 %v3405_v1 }
 0x927   : > { %3137 = vmatpush3.bf16.msra.mxu1 %v3311_v53 }
 0x928   : > { %3138 = vmatprep.subr.bf16.mxu1 %v3405_v1 }
 0x92b   : > { %3139 = vmatpush3.bf16.msra.mxu1 %v3313_v54 }
 0x92c   : > { %3140 = vmatprep.subr.bf16.mxu1 %v3405_v1 }
 0x92f   : > { %3141 = vmatpush3.bf16.msra.mxu1 %v3315_v11 }
 0x930   : > { %3158 = vmatprep.subr.bf16.mxu1 %v3405_v1 }
 0x9e5   : > { %v1639_v55 = vpop.f32.mrb[40].mxu1  ;;  %v1685_v56 = vpop.f32.mrb[40].mxu0 }
 0x9e6   : > { %v3096_v57 = vpop.f32.mrb[41].mxu1  ;;  %v1686_v58 = vadd.f32 %v1685_v56, %v1639_v55  ;;  %v3102_v59 = vpop.f32.mrb[41].mxu0 }
 0x9e7   : > { %v1642_v60 = vpop.f32.mrb[42].mxu1  ;;  %v1688_v61 = vpop.f32.mrb[42].mxu0 }
 0x9e8   : > { %v3097_v62 = vpop.f32.mrb[43].mxu1  ;;  %v3103_v63 = vpop.f32.mrb[43].mxu0 }
 0x9f5   : > { %v1758_v0 = vpop.f32.mrb[44].mxu1 }
 0x9f6   : > { %v1764_v2 = vpack.c.bf16 %v1758_v0, %v1758_v0  ;;  %v3114_v3 = vpop.f32.mrb[45].mxu1 }
 0x9f7   : > { %v1761_v4 = vpop.f32.mrb[46].mxu1 }
 0x9f8   : > { %v1771_v5 = vsel %vm487_vm2, %v1764_v2, 0  ;;  %v3115_v6 = vpop.f32.mrb[47].mxu1 }
 0x9f9   : > { %3117 = vmatpush3.bf16.msra.mxu0 %v1771_v5 }
 0x9fa   : > { %3122 = vmatprep.subr.bf16.mxu0 %v3405_v1 }
 0x9fc   : > { %3119 = vmatmul.mubr.msk.bf16.vlgmr.msra.gmra.mrb[44].mxu0 %vm483_vm3, %v2681_v9 }
 0x9fd   : > { %3123 = vmatpush3.bf16.msra.mxu0 %v3310_v7  ;;  %3130 = vmatprep.mubr.msk.bf16.mxu0 %vm3406_vm0, %v3405_v1 }
 0x9fe   : > { %3124 = vmatprep.subr.bf16.mxu0 %v3405_v1 }
 0xa01   : > { %3125 = vmatpush3.bf16.msra.mxu0 %v3312_v8 }
 0xa02   : > { %3126 = vmatprep.subr.bf16.mxu0 %v3405_v1 }
 0xa05   : > { %3127 = vmatpush3.bf16.msra.mxu0 %v3314_v10 }
 0xa06   : > { %3128 = vmatprep.subr.bf16.mxu0 %v3405_v1 }
 0xa09   : > { %3129 = vmatpush3.bf16.msra.mxu0 %v3316_v12 }
 0xa0a   : > { %3146 = vmatprep.subr.bf16.mxu0 %v3405_v1 }
 0xacf   : > { %v1807_v13 = vpop.f32.mrb[44].mxu0 }
 0xad0   : > { %v1813_v14 = vadd.f32 %v1807_v13, %v1686_v58  ;;  %v3120_v15 = vpop.f32.mrb[45].mxu0 }
 0xad1   : > { %v1810_v17 = vpop.f32.mrb[46].mxu0 }
 0xad2   : > { %v1820_v18 = vadd.f32 %v1818_v16, %v1813_v14  ;;  %v3121_v19 = vpop.f32.mrb[47].mxu0 }
 0xad4   : > { %v3894_v21 = vpack.c.bf16 %v1820_v18, %v1820_v18 }
 0xad6   : > { %3143 = vmatmul.mubr.msk.bf16.vlgmr.msra.gmra.mrb[48].mxu1 %vm361_vm1, %v3894_v21  ;;  %v3902_v23 = vshrl.u32 %v3894_v21, 16  ;;  %v1985_v33 = vrot.slane %v3894_v21, 1  ;;  %v2141_v43 = vrot.slane %v3894_v21, 2  ;;  %v2297_v51 = vrot.slane %v3894_v21, 3 }
 0xad7   : > { %3159 = vmatpush3.bf16.msra.mxu1 %v3317_v20  ;;  %3166 = vmatprep.mubr.msk.bf16.mxu1 %vm3406_vm0, %v3405_v1 }
 0xad8   : > { %3131 = vmatmul.mubr.msk.bf16.vlgmr.msra.gmra.mrb[48].mxu0 %vm361_vm1, %v3902_v23  ;;  %3160 = vmatprep.subr.bf16.mxu1 %v3405_v1  ;;  %v2063_v31 = vrot.slane %v3902_v23, 1  ;;  %v2219_v41 = vrot.slane %v3902_v23, 2  ;;  %v2375_v50 = vrot.slane %v3902_v23, 3 }
 0xad9   : > { %3147 = vmatpush3.bf16.msra.mxu0 %v3318_v22  ;;  %3154 = vmatprep.mubr.msk.bf16.mxu0 %vm3406_vm0, %v3405_v1 }
 0xada   : > { %3148 = vmatprep.subr.bf16.mxu0 %v3405_v1 }
 0xadb   : > { %3161 = vmatpush3.bf16.msra.mxu1 %v3319_v24  ;;  %v2444_v24 = vld [vmem:[%s4076_s8] sm:$0x1] }
 0xadc   : > { %3162 = vmatprep.subr.bf16.mxu1 %v3405_v1 }
 0xadd   : > { %3149 = vmatpush3.bf16.msra.mxu0 %v3320_v25 }
 0xade   : > { %3150 = vmatprep.subr.bf16.mxu0 %v3405_v1 }
 0xadf   : > { %3163 = vmatpush3.bf16.msra.mxu1 %v3321_v26 }
 0xae0   : > { %3164 = vmatprep.subr.bf16.mxu1 %v3405_v1 }
 0xae1   : > { %3151 = vmatpush3.bf16.msra.mxu0 %v3322_v27 }
 0xae2   : > { %3152 = vmatprep.subr.bf16.mxu0 %v3405_v1 }
 0xae3   : > { %3165 = vmatpush3.bf16.msra.mxu1 %v3323_v28 }
 0xae4   : > { %3182 = vmatprep.subr.bf16.mxu1 %v3405_v1 }
 0xae5   : > { %3153 = vmatpush3.bf16.msra.mxu0 %v3324_v29 }
 0xae6   : > { %3167 = vmatmul.mubr.msk.bf16.vlgmr.msra.gmra.mrb[52].mxu1 %vm361_vm1, %v2063_v31  ;;  %3170 = vmatprep.subr.bf16.mxu0 %v3405_v1 }
 0xae7   : > { %3183 = vmatpush3.bf16.msra.mxu1 %v3325_v30  ;;  %3190 = vmatprep.mubr.msk.bf16.mxu1 %vm3406_vm0, %v3405_v1 }
 0xae8   : > { %3155 = vmatmul.mubr.msk.bf16.vlgmr.msra.gmra.mrb[52].mxu0 %vm361_vm1, %v1985_v33  ;;  %3184 = vmatprep.subr.bf16.mxu1 %v3405_v1 }
 0xae9   : > { %3171 = vmatpush3.bf16.msra.mxu0 %v3326_v32  ;;  %3178 = vmatprep.mubr.msk.bf16.mxu0 %vm3406_vm0, %v3405_v1 }
 0xaea   : > { %3172 = vmatprep.subr.bf16.mxu0 %v3405_v1 }
 0xaeb   : > { %3185 = vmatpush3.bf16.msra.mxu1 %v3327_v34 }
 0xaec   : > { %3186 = vmatprep.subr.bf16.mxu1 %v3405_v1 }
 0xaed   : > { %3173 = vmatpush3.bf16.msra.mxu0 %v3328_v35 }
 0xaee   : > { %3174 = vmatprep.subr.bf16.mxu0 %v3405_v1 }
 0xaef   : > { %3187 = vmatpush3.bf16.msra.mxu1 %v3329_v36 }
 0xaf0   : > { %3188 = vmatprep.subr.bf16.mxu1 %v3405_v1 }
 0xaf1   : > { %3175 = vmatpush3.bf16.msra.mxu0 %v3330_v37 }
 0xaf2   : > { %3176 = vmatprep.subr.bf16.mxu0 %v3405_v1 }
 0xaf3   : > { %3189 = vmatpush3.bf16.msra.mxu1 %v3331_v38 }
 0xaf4   : > { %3206 = vmatprep.subr.bf16.mxu1 %v3405_v1 }
 0xaf5   : > { %3177 = vmatpush3.bf16.msra.mxu0 %v3332_v39 }
 0xaf6   : > { %3191 = vmatmul.mubr.msk.bf16.vlgmr.msra.gmra.mrb[56].mxu1 %vm361_vm1, %v2219_v41  ;;  %3194 = vmatprep.subr.bf16.mxu0 %v3405_v1 }
 0xaf7   : > { %3207 = vmatpush3.bf16.msra.mxu1 %v3333_v40  ;;  %3214 = vmatprep.mubr.msk.bf16.mxu1 %vm3406_vm0, %v3405_v1 }
 0xaf8   : > { %3179 = vmatmul.mubr.msk.bf16.vlgmr.msra.gmra.mrb[56].mxu0 %vm361_vm1, %v2141_v43  ;;  %3208 = vmatprep.subr.bf16.mxu1 %v3405_v1 }
 0xaf9   : > { %3195 = vmatpush3.bf16.msra.mxu0 %v3334_v42  ;;  %3202 = vmatprep.mubr.msk.bf16.mxu0 %vm3406_vm0, %v3405_v1 }
 0xafa   : > { %3196 = vmatprep.subr.bf16.mxu0 %v3405_v1 }
 0xafb   : > { %3209 = vmatpush3.bf16.msra.mxu1 %v3335_v44 }
 0xafc   : > { %3210 = vmatprep.subr.bf16.mxu1 %v3405_v1 }
 0xafd   : > { %3197 = vmatpush3.bf16.msra.mxu0 %v3336_v45 }
 0xafe   : > { %3198 = vmatprep.subr.bf16.mxu0 %v3405_v1 }
 0xaff   : > { %3211 = vmatpush3.bf16.msra.mxu1 %v3337_v46 }
 0xb00   : > { %3212 = vmatprep.subr.bf16.mxu1 %v3405_v1 }
 0xb01   : > { %3199 = vmatpush3.bf16.msra.mxu0 %v3338_v47 }
 0xb02   : > { %3200 = vmatprep.subr.bf16.mxu0 %v3405_v1 }
 0xb03   : > { %3213 = vmatpush3.bf16.msra.mxu1 %v3339_v48 }
 0xb05   : > { %3201 = vmatpush3.bf16.msra.mxu0 %v3340_v49 }
 0xb06   : > { %3215 = vmatmul.mubr.msk.bf16.vlgmr.msra.gmra.mrb[60].mxu1 %vm361_vm1, %v2375_v50 }
 0xb08   : > { %3203 = vmatmul.mubr.msk.bf16.vlgmr.msra.gmra.mrb[60].mxu0 %vm361_vm1, %v2297_v51 }
 0xba9   : > { %v1969_v52 = vpop.f32.mrb[48].mxu1 }
 0xbaa   : > { %v3144_v53 = vpop.f32.mrb[49].mxu1 }
 0xbab   : > { %v1903_v54 = vpop.f32.mrb[48].mxu0  ;;  %v1972_v55 = vpop.f32.mrb[50].mxu1 }
 0xbac   : > { %v1970_v56 = vadd.f32 %v1969_v52, %v1903_v54  ;;  %v3132_v57 = vpop.f32.mrb[49].mxu0  ;;  %v3145_v58 = vpop.f32.mrb[51].mxu1 }
 0xbad   : > { %v1906_v59 = vpop.f32.mrb[50].mxu0 }
 0xbae   : > { %v3133_v60 = vpop.f32.mrb[51].mxu0 }
 0xbb9   : > { %v2125_v1 = vpop.f32.mrb[52].mxu1 }
 0xbba   : > { %v3168_v61 = vpop.f32.mrb[53].mxu1 }
 0xbbb   : > { %v2047_v62 = vpop.f32.mrb[52].mxu0  ;;  %v2128_v63 = vpop.f32.mrb[54].mxu1 }
 0xbbc   : > { %v2053_v0 = vadd.f32 %v2047_v62, %v1970_v56  ;;  %v3156_v2 = vpop.f32.mrb[53].mxu0  ;;  %v3169_v3 = vpop.f32.mrb[55].mxu1 }
 0xbbd   : > { %v2050_v4 = vpop.f32.mrb[54].mxu0 }
 0xbbe   : > { %v3157_v5 = vpop.f32.mrb[55].mxu0  ;;  %v2131_v6 = vadd.f32 %v2125_v1, %v2053_v0 }
 0xbc9   : > { %v2281_v9 = vpop.f32.mrb[56].mxu1 }
 0xbca   : > { %v3192_v7 = vpop.f32.mrb[57].mxu1 }
 0xbcb   : > { %v2203_v8 = vpop.f32.mrb[56].mxu0  ;;  %v2284_v10 = vpop.f32.mrb[58].mxu1 }
 0xbcc   : > { %v2209_v11 = vadd.f32 %v2203_v8, %v2131_v6  ;;  %v3180_v12 = vpop.f32.mrb[57].mxu0  ;;  %v3193_v13 = vpop.f32.mrb[59].mxu1 }
 0xbcd   : > { %v2206_v14 = vpop.f32.mrb[58].mxu0 }
 0xbce   : > { %v3181_v15 = vpop.f32.mrb[59].mxu0  ;;  %v2287_v16 = vadd.f32 %v2281_v9, %v2209_v11 }
 0xbd9   : > { %v2437_v17 = vpop.f32.mrb[60].mxu1 }
 0xbda   : > { %v3216_v18 = vpop.f32.mrb[61].mxu1 }
 0xbdb   : > { %v2359_v19 = vpop.f32.mrb[60].mxu0  ;;  %v2440_v20 = vpop.f32.mrb[62].mxu1 }
 0xbdc   : > { %v2365_v21 = vadd.f32 %v2359_v19, %v2287_v16  ;;  %v3204_v22 = vpop.f32.mrb[61].mxu0  ;;  %v3217_v23 = vpop.f32.mrb[63].mxu1 }
 0xbdd   : > { %v2362_v25 = vpop.f32.mrb[62].mxu0 }
 0xbde   : > { %v2443_v26 = vadd.f32 %v2437_v17, %v2365_v21  ;;  %v3205_v27 = vpop.f32.mrb[63].mxu0 }
 0xbe0   : > { %v2445_v28 = vadd.f32 %v2444_v24, %v2443_v26 }
 0xbe2   : > { %2447 = vst.msk [vmem:[%s322_s26] sm:$0x1] %vm2446_vm4, %v2445_v28 }
 0xbe3   : > { %3354 = shalt.err (!%p3351_p3)
}
 0xbe4   : > { %s3355_s22 = scalar_lea.hbm %s4026_s14, 16  ;;  %s3359_s26 = scalar_lea.hbm %s4077_s9, 32 }
 0xbe5   : > { %p3356_p4 = scmp.ne.s32.totalorder %s4026_s14, %s3355_s22  ;;  %p3360_p9 = scmp.lt.u32.totalorder %s4026_s14, %s4077_s9 }
 0xbe6   : > { %p3361_p10 = scmp.lt.u32.totalorder %s3359_s26, %s3355_s22  ;;  %p3363_p12 = scmp.lt.u32.totalorder %s3355_s22, %s4026_s14 }
 0xbe7   : > { %p3357_p7 = pnand %p3356_p4, %p3497_p5 }
 0xbe8   : > { %p3362_p11 = por %p3361_p10, %p3360_p9 }
 0xbe9   : > { %p3358_p8 = pneg %p3357_p7 }
 0xbea   : > { %p3364_p13 = por %p3363_p12, %p3362_p11 }
 0xbec   : > { %p3365_p0 = pnand %p3364_p13, %p3358_p8 }
 0xbee   : > { %3368 = shalt.err (!%p3365_p0)
}
 0xbef   : > { %3218 = dma.vmem_to_hbm [thread:$0]  (%p3497_p5), %s4028_s27, 16, %s4026_s14, %s2449_s16  }
 0xbf0 PF: > { %p3224_p1 = scmp.ge.s32.totalorder %s3403_s12, 2  ;;  %s2473_s17 = sand.u32 1, %s3391_s30  }
 0xbf1   : > { %s2474_s13 = scalar_lea.sflag [#allocation3], %s2473_s17 }
 0xbf2   : > { %p3221_p2 = pnand %p3224_p1, %p3501_p6 }
 0xbf4   : > { %3386 = dma.done.wait (!%p3221_p2), %s2474_s13, 16  }
 0xbf5   : > { %3388 = vsyncadd (!%p3221_p2), %s2474_s13, 4294967280  ;;  %p19_p3 = scmp.ge.s32.totalorder %s3484_s15, 4   ;;  %s4080_s30 = smov %s3395_s10 }
 0xbf6   : > { %s4081_s10 = smov %s3399_s11  ;;  %s4082_s11 = smov %s3495_s18 }
 0xbf7   : > { %s4083_s12 = smov %s3484_s15  ;;  %21 = sbr.rel (!%p19_p3) target bundleno = 3 (0x3), region = 118 }
 0xbfe   :  { %2478 = vsyncpa [#allocation3], 1 }
 0xbff   :  { %2480 = vsyncpa [#allocation3 + $0x1], 1 }

</bundles_post_ra>
